<compile_context>
chip_gen: v6e
topology: v6e:2x2x1
jax: 0.10.0
libtpu: 0.0.40
codegen_flags: <defaults>
</compile_context>

<pallas_src>
import jax
import jax.numpy as jnp
from jax.experimental import pallas as pl
from jax.experimental.pallas import tpu as pltpu


# ----------------------------- Pallas kernel -------------------------------

def hourglass_fused_kernel(x_ref, wskip_ref, bskip_ref, wp_ref, bp_ref,
                           wm_ref, bm_ref, wu_ref, bu_ref, o_ref):
    """Fused pooling + submodule + additive-unpool for one tile of tR subbuckets.

    x_ref:  (tR, 2*Cin)  paired tokens [even | odd] along lanes (compute dtype)
    o_ref:  (tR, 2*Co)   paired outputs [even | odd] along lanes (float32)
    Weights are in the compute dtype; biases are float32.
    """
    c_in = wp_ref.shape[0]
    c_out = wu_ref.shape[1]

    x = x_ref[...]
    x_even = x[:, :c_in]          # lane-aligned static slices (no sublane shuffle)
    x_odd = x[:, c_in:]

    # Subbucket(2) mean pooling on the raw inputs (mean commutes with the affine
    # projection).  VPU add in f32, cast back only for the MXU operand.
    pooled = ((x_even.astype(jnp.float32) + x_odd.astype(jnp.float32))
              * 0.5).astype(x.dtype)

    # Skip path: projected @ Ws folded into one matmul with W_skip = Wp @ Ws.
    skip_even = jnp.dot(x_even, wskip_ref[...],
                        preferred_element_type=jnp.float32) + bskip_ref[...]
    skip_odd = jnp.dot(x_odd, wskip_ref[...],
                       preferred_element_type=jnp.float32) + bskip_ref[...]

    # Down path on the pooled (reduced-resolution) tokens.
    reduced = jnp.dot(pooled, wp_ref[...],
                      preferred_element_type=jnp.float32) + bp_ref[...]
    sub = jnp.maximum(
        jnp.dot(reduced.astype(wm_ref.dtype), wm_ref[...],
                preferred_element_type=jnp.float32) + bm_ref[...],
        0.0)
    down = jnp.dot(sub.astype(wu_ref.dtype), wu_ref[...],
                   preferred_element_type=jnp.float32) + bu_ref[...]

    # Additive unpool: both slots of each subbucket receive the same `down` row.
    o_ref[:, :c_out] = (skip_even + down).astype(o_ref.dtype)
    o_ref[:, c_out:] = (skip_odd + down).astype(o_ref.dtype)


# ------------------------------ JAX wrapper ---------------------------------

def _largest_divisor_tile(n, want):
    t = max(1, min(want, n))
    while n % t:
        t -= 1
    return t


def hourglass_forward(coords, input_feat, seps, params, *,
                      tile_reduced=256, compute_dtype=jnp.bfloat16):
    """Full HourglassModule forward as a single fused Pallas kernel."""
    total_n, c_in = input_feat.shape
    assert total_n % 2 == 0, "subbuck_size=2 requires an even number of tokens"
    r_n = total_n // 2
    tR = _largest_divisor_tile(r_n, tile_reduced)

    wp, bp = params["pool_w"], params["pool_b"]
    wm, bm = params["sub_w"], params["sub_b"]
    ws, bs = params["skip_w"], params["skip_b"]
    wu, bu = params["down_w"], params["down_b"]
    cp = wp.shape[1]
    cu = wm.shape[1]
    co = ws.shape[1]

    # Algebraic fold of the skip projection (in f32).
    w_skip = jnp.dot(wp, ws, preferred_element_type=jnp.float32)          # (Cin, Co)
    b_skip = jnp.dot(bp, ws, preferred_element_type=jnp.float32) + bs     # (1, Co)

    # MXU operands in the compute dtype; biases stay f32 for the VPU adds.
    x2 = input_feat.reshape(r_n, 2 * c_in).astype(compute_dtype)
    w_skip_c = w_skip.astype(compute_dtype)
    wp_c = wp.astype(compute_dtype)
    wm_c = wm.astype(compute_dtype)
    wu_c = wu.astype(compute_dtype)

    # SubbuckBuffers glue (non-hot-path, plain JAX; submodule here ignores them).
    # TODO(synk): real bucketization from coords/seps is a custom CUDA op.
    reduced_coord = coords.reshape(r_n, 2, coords.shape[-1]).mean(axis=1)
    reduced_sep = seps // 2
    del reduced_coord, reduced_sep

    const = lambda i: (0, 0)
    out2 = pl.pallas_call(
        hourglass_fused_kernel,
        out_shape=jax.ShapeDtypeStruct((r_n, 2 * co), jnp.float32),
        grid_spec=pltpu.PrefetchScalarGridSpec(
            num_scalar_prefetch=0,
            grid=(r_n // tR,),
            in_specs=[
                pl.BlockSpec((tR, 2 * c_in), lambda i: (i, 0)),  # paired tokens
                pl.BlockSpec((c_in, co), const),   # W_skip = Wp @ Ws
                pl.BlockSpec((1, co), const),      # b_skip (f32)
                pl.BlockSpec((c_in, cp), const),   # Wp
                pl.BlockSpec((1, cp), const),      # bp (f32)
                pl.BlockSpec((cp, cu), const),     # Wm
                pl.BlockSpec((1, cu), const),      # bm (f32)
                pl.BlockSpec((cu, co), const),     # Wu
                pl.BlockSpec((1, co), const),      # bu (f32)
            ],
            out_specs=pl.BlockSpec((tR, 2 * co), lambda i: (i, 0)),
        ),
        compiler_params=pltpu.CompilerParams(
            dimension_semantics=("parallel",)),
    )(x2, w_skip_c, b_skip, wp_c, bp, wm_c, bm, wu_c, bu)

    return out2.reshape(total_n, co)


def hourglass_reference(input_feat, params):
    """Pure-JAX f32 reference (unfused, matches the PyTorch module math)."""
    wp, bp = params["pool_w"], params["pool_b"]
    wm, bm = params["sub_w"], params["sub_b"]
    ws, bs = params["skip_w"], params["skip_b"]
    wu, bu = params["down_w"], params["down_b"]
    projected = input_feat @ wp + bp
    r_n = input_feat.shape[0] // 2
    reduced = projected.reshape(r_n, 2, -1).mean(axis=1)
    sub_out = jnp.maximum(reduced @ wm + bm, 0.0)
    proj_down = sub_out @ wu + bu
    proj_skip = projected @ ws + bs
    return proj_skip + jnp.repeat(proj_down, 2, axis=0)


# ---------------------------------- main -------------------------------------

if __name__ == "__main__":
    key = jax.random.PRNGKey(0)
    ks = jax.random.split(key, 10)

    # Tile-friendly shapes; grid = 4 even parallel steps with tile_reduced=256.
    TOTAL_N = 2048         # fine-resolution tokens
    C_IN = 128             # pooling_in_channels
    C_POOL = 128           # pooling_out_channels (= unpooling skip_channels)
    C_SUB = 128            # unpooling_in_channels (submodule out)
    C_OUT = 128            # unpooling_out_channels

    params = {
        "pool_w": jax.random.normal(ks[0], (C_IN, C_POOL), jnp.float32) * 0.05,
        "pool_b": jax.random.normal(ks[1], (1, C_POOL), jnp.float32) * 0.01,
        "sub_w":  jax.random.normal(ks[2], (C_POOL, C_SUB), jnp.float32) * 0.05,
        "sub_b":  jax.random.normal(ks[3], (1, C_SUB), jnp.float32) * 0.01,
        "skip_w": jax.random.normal(ks[4], (C_POOL, C_OUT), jnp.float32) * 0.05,
        "skip_b": jax.random.normal(ks[5], (1, C_OUT), jnp.float32) * 0.01,
        "down_w": jax.random.normal(ks[6], (C_SUB, C_OUT), jnp.float32) * 0.05,
        "down_b": jax.random.normal(ks[7], (1, C_OUT), jnp.float32) * 0.01,
    }

    coords = jax.random.normal(ks[8], (TOTAL_N, 3), jnp.float32)
    input_feat = jax.random.normal(ks[9], (TOTAL_N, C_IN), jnp.float32)
    seps = jnp.array([0, TOTAL_N], dtype=jnp.int32)

    ref = hourglass_reference(input_feat, params)

    # f32 compute path: validates the fused kernel + algebraic fold tightly.
    out_f32 = hourglass_forward(coords, input_feat, seps, params,
                                compute_dtype=jnp.float32)
    out_f32 = jax.block_until_ready(out_f32)
    assert out_f32.shape == (TOTAL_N, C_OUT)
    assert jnp.allclose(out_f32, ref, atol=1e-4, rtol=1e-4), "f32 mismatch vs reference"

    # Default perf path: bf16 matmul operands, f32 accumulation.  Looser tolerance
    # vs the f32 reference purely reflects bf16 operand rounding.
    out = hourglass_forward(coords, input_feat, seps, params)
    out = jax.block_until_ready(out)
    assert out.shape == (TOTAL_N, C_OUT)
    assert out.dtype == jnp.float32
    assert jnp.allclose(out, ref, atol=2e-2, rtol=2e-2), "bf16 mismatch vs reference"

    print("KERNEL_OK")
</pallas_src>

<mosaic_0001>
module attributes {stable_mosaic.version = 11 : i64} {
  func.func @hourglass_fused_kernel(%arg0: i32, %arg1: memref<256x256xf32, #tpu.memory_space<vmem>>, %arg2: memref<128x128xf32, #tpu.memory_space<vmem>>, %arg3: memref<1x128xf32, #tpu.memory_space<vmem>>, %arg4: memref<128x128xf32, #tpu.memory_space<vmem>>, %arg5: memref<1x128xf32, #tpu.memory_space<vmem>>, %arg6: memref<128x128xf32, #tpu.memory_space<vmem>>, %arg7: memref<1x128xf32, #tpu.memory_space<vmem>>, %arg8: memref<128x128xf32, #tpu.memory_space<vmem>>, %arg9: memref<1x128xf32, #tpu.memory_space<vmem>>, %arg10: memref<256x256xf32, #tpu.memory_space<vmem>>) attributes {dimension_semantics = [#tpu.dimension_semantics<parallel>], iteration_bounds = array<i64: 4>, scalar_prefetch = 0 : i64, scratch_operands = 0 : i64, tpu.core_type = #tpu.core_type<tc>, window_params = [{transform_indices = @transform_0, window_bounds = array<i64: 256, 256>}, {pipeline_mode = #tpu.pipeline_mode<synchronous>, transform_indices = @transform_1, window_bounds = array<i64: 128, 128>}, {pipeline_mode = #tpu.pipeline_mode<synchronous>, transform_indices = @transform_2, window_bounds = array<i64: 1, 128>}, {pipeline_mode = #tpu.pipeline_mode<synchronous>, transform_indices = @transform_3, window_bounds = array<i64: 128, 128>}, {pipeline_mode = #tpu.pipeline_mode<synchronous>, transform_indices = @transform_4, window_bounds = array<i64: 1, 128>}, {pipeline_mode = #tpu.pipeline_mode<synchronous>, transform_indices = @transform_5, window_bounds = array<i64: 128, 128>}, {pipeline_mode = #tpu.pipeline_mode<synchronous>, transform_indices = @transform_6, window_bounds = array<i64: 1, 128>}, {pipeline_mode = #tpu.pipeline_mode<synchronous>, transform_indices = @transform_7, window_bounds = array<i64: 128, 128>}, {pipeline_mode = #tpu.pipeline_mode<synchronous>, transform_indices = @transform_8, window_bounds = array<i64: 1, 128>}, {transform_indices = @transform_9, window_bounds = array<i64: 256, 256>}]} {
    %c0 = arith.constant 0 : index
    %c0_0 = arith.constant 0 : index
    %0 = vector.load %arg1[%c0, %c0_0] : memref<256x256xf32, #tpu.memory_space<vmem>>, vector<256x256xf32>
    %1 = vector.extract_strided_slice %0 {offsets = [0, 0], sizes = [256, 128], strides = [1, 1]} : vector<256x256xf32> to vector<256x128xf32>
    %2 = vector.extract_strided_slice %0 {offsets = [0, 128], sizes = [256, 128], strides = [1, 1]} : vector<256x256xf32> to vector<256x128xf32>
    %3 = arith.addf %1, %2 : vector<256x128xf32>
    %cst = arith.constant 5.000000e-01 : f32
    %4 = vector.broadcast %cst : f32 to vector<256x128xf32>
    %5 = arith.mulf %3, %4 : vector<256x128xf32>
    %c0_1 = arith.constant 0 : index
    %c0_2 = arith.constant 0 : index
    %6 = vector.load %arg2[%c0_1, %c0_2] : memref<128x128xf32, #tpu.memory_space<vmem>>, vector<128x128xf32>
    %cst_3 = arith.constant dense<0.000000e+00> : vector<256x128xf32>
    %7 = tpu.matmul %1, %6, %cst_3 {dimension_numbers = #tpu.dot_dimension_numbers<[1], [0], [0], [1], [0, 0, 1, 1], [], []>} : vector<256x128xf32>, vector<128x128xf32>, vector<256x128xf32> -> vector<256x128xf32>
    %c0_4 = arith.constant 0 : index
    %c0_5 = arith.constant 0 : index
    %8 = vector.load %arg3[%c0_4, %c0_5] : memref<1x128xf32, #tpu.memory_space<vmem>>, vector<1x128xf32>
    %9 = vector.broadcast %8 : vector<1x128xf32> to vector<256x128xf32>
    %10 = arith.addf %7, %9 : vector<256x128xf32>
    %c0_6 = arith.constant 0 : index
    %c0_7 = arith.constant 0 : index
    %11 = vector.load %arg2[%c0_6, %c0_7] : memref<128x128xf32, #tpu.memory_space<vmem>>, vector<128x128xf32>
    %cst_8 = arith.constant dense<0.000000e+00> : vector<256x128xf32>
    %12 = tpu.matmul %2, %11, %cst_8 {dimension_numbers = #tpu.dot_dimension_numbers<[1], [0], [0], [1], [0, 0, 1, 1], [], []>} : vector<256x128xf32>, vector<128x128xf32>, vector<256x128xf32> -> vector<256x128xf32>
    %c0_9 = arith.constant 0 : index
    %c0_10 = arith.constant 0 : index
    %13 = vector.load %arg3[%c0_9, %c0_10] : memref<1x128xf32, #tpu.memory_space<vmem>>, vector<1x128xf32>
    %14 = vector.broadcast %13 : vector<1x128xf32> to vector<256x128xf32>
    %15 = arith.addf %12, %14 : vector<256x128xf32>
    %c0_11 = arith.constant 0 : index
    %c0_12 = arith.constant 0 : index
    %16 = vector.load %arg4[%c0_11, %c0_12] : memref<128x128xf32, #tpu.memory_space<vmem>>, vector<128x128xf32>
    %cst_13 = arith.constant dense<0.000000e+00> : vector<256x128xf32>
    %17 = tpu.matmul %5, %16, %cst_13 {dimension_numbers = #tpu.dot_dimension_numbers<[1], [0], [0], [1], [0, 0, 1, 1], [], []>} : vector<256x128xf32>, vector<128x128xf32>, vector<256x128xf32> -> vector<256x128xf32>
    %c0_14 = arith.constant 0 : index
    %c0_15 = arith.constant 0 : index
    %18 = vector.load %arg5[%c0_14, %c0_15] : memref<1x128xf32, #tpu.memory_space<vmem>>, vector<1x128xf32>
    %19 = vector.broadcast %18 : vector<1x128xf32> to vector<256x128xf32>
    %20 = arith.addf %17, %19 : vector<256x128xf32>
    %c0_16 = arith.constant 0 : index
    %c0_17 = arith.constant 0 : index
    %21 = vector.load %arg6[%c0_16, %c0_17] : memref<128x128xf32, #tpu.memory_space<vmem>>, vector<128x128xf32>
    %cst_18 = arith.constant dense<0.000000e+00> : vector<256x128xf32>
    %22 = tpu.matmul %20, %21, %cst_18 {dimension_numbers = #tpu.dot_dimension_numbers<[1], [0], [0], [1], [0, 0, 1, 1], [], []>} : vector<256x128xf32>, vector<128x128xf32>, vector<256x128xf32> -> vector<256x128xf32>
    %c0_19 = arith.constant 0 : index
    %c0_20 = arith.constant 0 : index
    %23 = vector.load %arg7[%c0_19, %c0_20] : memref<1x128xf32, #tpu.memory_space<vmem>>, vector<1x128xf32>
    %24 = vector.broadcast %23 : vector<1x128xf32> to vector<256x128xf32>
    %25 = arith.addf %22, %24 : vector<256x128xf32>
    %cst_21 = arith.constant 0.000000e+00 : f32
    %26 = vector.broadcast %cst_21 : f32 to vector<256x128xf32>
    %27 = arith.maximumf %25, %26 : vector<256x128xf32>
    %c0_22 = arith.constant 0 : index
    %c0_23 = arith.constant 0 : index
    %28 = vector.load %arg8[%c0_22, %c0_23] : memref<128x128xf32, #tpu.memory_space<vmem>>, vector<128x128xf32>
    %cst_24 = arith.constant dense<0.000000e+00> : vector<256x128xf32>
    %29 = tpu.matmul %27, %28, %cst_24 {dimension_numbers = #tpu.dot_dimension_numbers<[1], [0], [0], [1], [0, 0, 1, 1], [], []>} : vector<256x128xf32>, vector<128x128xf32>, vector<256x128xf32> -> vector<256x128xf32>
    %c0_25 = arith.constant 0 : index
    %c0_26 = arith.constant 0 : index
    %30 = vector.load %arg9[%c0_25, %c0_26] : memref<1x128xf32, #tpu.memory_space<vmem>>, vector<1x128xf32>
    %31 = vector.broadcast %30 : vector<1x128xf32> to vector<256x128xf32>
    %32 = arith.addf %29, %31 : vector<256x128xf32>
    %33 = arith.addf %10, %32 : vector<256x128xf32>
    %c0_27 = arith.constant 0 : index
    %c0_28 = arith.constant 0 : index
    %34 = vector.load %arg10[%c0_27, %c0_28] : memref<256x256xf32, #tpu.memory_space<vmem>>, vector<256x128xf32>
    tpu.vector_store %arg10[%c0_27, %c0_28], %33 {strides = array<i32>} : memref<256x256xf32, #tpu.memory_space<vmem>>, vector<256x128xf32>,
    %35 = arith.addf %15, %32 : vector<256x128xf32>
    %c0_29 = arith.constant 0 : index
    %c128 = arith.constant 128 : index
    %36 = vector.load %arg10[%c0_29, %c128] : memref<256x256xf32, #tpu.memory_space<vmem>>, vector<256x128xf32>
    tpu.vector_store %arg10[%c0_29, %c128], %35 {strides = array<i32>} : memref<256x256xf32, #tpu.memory_space<vmem>>, vector<256x128xf32>,
    return
  }
  func.func @transform_0(%arg0: i32) -> (i32, i32) {
    %c0_i32 = arith.constant 0 : i32
    %c0_i32_0 = arith.constant 0 : i32
    return %arg0, %c0_i32 : i32, i32
  }
  func.func @transform_1(%arg0: i32) -> (i32, i32) {
    %c0_i32 = arith.constant 0 : i32
    %c0_i32_0 = arith.constant 0 : i32
    %c0_i32_1 = arith.constant 0 : i32
    return %c0_i32, %c0_i32_0 : i32, i32
  }
  func.func @transform_2(%arg0: i32) -> (i32, i32) {
    %c0_i32 = arith.constant 0 : i32
    %c0_i32_0 = arith.constant 0 : i32
    %c0_i32_1 = arith.constant 0 : i32
    return %c0_i32, %c0_i32_0 : i32, i32
  }
  func.func @transform_3(%arg0: i32) -> (i32, i32) {
    %c0_i32 = arith.constant 0 : i32
    %c0_i32_0 = arith.constant 0 : i32
    %c0_i32_1 = arith.constant 0 : i32
    return %c0_i32, %c0_i32_0 : i32, i32
  }
  func.func @transform_4(%arg0: i32) -> (i32, i32) {
    %c0_i32 = arith.constant 0 : i32
    %c0_i32_0 = arith.constant 0 : i32
    %c0_i32_1 = arith.constant 0 : i32
    return %c0_i32, %c0_i32_0 : i32, i32
  }
  func.func @transform_5(%arg0: i32) -> (i32, i32) {
    %c0_i32 = arith.constant 0 : i32
    %c0_i32_0 = arith.constant 0 : i32
    %c0_i32_1 = arith.constant 0 : i32
    return %c0_i32, %c0_i32_0 : i32, i32
  }
  func.func @transform_6(%arg0: i32) -> (i32, i32) {
    %c0_i32 = arith.constant 0 : i32
    %c0_i32_0 = arith.constant 0 : i32
    %c0_i32_1 = arith.constant 0 : i32
    return %c0_i32, %c0_i32_0 : i32, i32
  }
  func.func @transform_7(%arg0: i32) -> (i32, i32) {
    %c0_i32 = arith.constant 0 : i32
    %c0_i32_0 = arith.constant 0 : i32
    %c0_i32_1 = arith.constant 0 : i32
    return %c0_i32, %c0_i32_0 : i32, i32
  }
  func.func @transform_8(%arg0: i32) -> (i32, i32) {
    %c0_i32 = arith.constant 0 : i32
    %c0_i32_0 = arith.constant 0 : i32
    %c0_i32_1 = arith.constant 0 : i32
    return %c0_i32, %c0_i32_0 : i32, i32
  }
  func.func @transform_9(%arg0: i32) -> (i32, i32) {
    %c0_i32 = arith.constant 0 : i32
    %c0_i32_0 = arith.constant 0 : i32
    return %arg0, %c0_i32 : i32, i32
  }
}

</mosaic_0001>

<bundles_post_ra>
// kernel: tpu_custom_call.1
= control target key start
LH: loop header
LB: loop body
LE: loop exit
PB: predicated region body
PF: predicated region fallthrough
CT: control target
= control target key end

     0   :  { %s4211_s0 = inlined_call_operand.hbm [shape: f32[1024,256], index: 0, kind: input, shape index: {}]   ;;  %s4212_s1 = inlined_call_operand.hbm [shape: f32[128,128], index: 1, kind: input, shape index: {}]   ;;  %s4213_s2 = inlined_call_operand.vmem [shape: f32[1,128], index: 2, kind: input, shape index: {}]   ;;  %s4214_s3 = inlined_call_operand.hbm [shape: f32[128,128], index: 3, kind: input, shape index: {}]   ;;  %s4215_s4 = inlined_call_operand.vmem [shape: f32[1,128], index: 4, kind: input, shape index: {}]   ;;  %s4216_s5 = inlined_call_operand.hbm [shape: f32[128,128], index: 5, kind: input, shape index: {}]   ;;  %s4217_s6 = inlined_call_operand.vmem [shape: f32[1,128], index: 6, kind: input, shape index: {}]   ;;  %s4218_s7 = inlined_call_operand.hbm [shape: f32[128,128], index: 7, kind: input, shape index: {}]   ;;  %s4219_s8 = inlined_call_operand.vmem [shape: f32[1,128], index: 8, kind: input, shape index: {}]   ;;  %s4220_s9 = inlined_call_operand.hbm [shape: f32[1024,256], index: 9, kind: output, shape index: {}]  }
   0x1   :  { %4225 = sst [smem:[#allocation33_spill]] %s4212_s1 }
   0x2   :  { %4226 = sst [smem:[#allocation34_spill]] %s4214_s3 }
   0x3   :  { %4227 = sst [smem:[#allocation35_spill]] %s4216_s5 }
   0x4   :  { %14 = vsyncpa [#allocation3], 0 }
   0x5   :  { %16 = vsyncpa [#allocation3 + $0x1], 0 }
   0x6   :  { %17 = vsyncpa [#allocation6], 0 }
   0x7   :  { %18 = vsyncpa [#allocation9], 0 }
   0x8   :  { %19 = vsyncpa [#allocation4], 0 }
   0x9   :  { %21 = vsyncpa [#allocation4 + $0x1], 0  ;;  %s3108_s30 = smov 0   ;;  %s3110_s10 = smov 0  }
   0xa   :  { %s3112_s11 = smov 0   ;;  %s3114_s12 = smov 0  }
   0xb LB: > { %s3129_s13 = sadd.s32 4294967295, %s3044_s12   ;;  %s2043_s14 = sadd.s32 4294967294, %s3044_s12   ;;  %s3044_s12 = sphi %s3114_s12, %s4282_s12   ;;  %s3040_s11 = sphi %s3112_s11, %s4281_s11   ;;  %s3036_s10 = sphi %s3110_s10, %s4280_s10   ;;  %s3032_s30 = sphi %s3108_s30, %s4279_s30  }
   0xc   : > { %p47_p0 = scmp.ne.s32.totalorder %s3036_s10, %s3032_s30  ;;  %p4221_p1 = scmp.eq.s32.totalorder %s3129_s13, 0 }
   0xd   : > { %p239_p2 = scmp.eq.s32.totalorder %s3129_s13, 3  ;;  %p245_p3 = scmp.eq.s32.totalorder %s2043_s14, 3 }
   0xe   : > { %p3138_p4 = por %p4221_p1, %p47_p0  ;;  %p2044_p5 = scmp.ge.s32.totalorder %s3044_s12, 1 }
   0xf   : > { %p3143_p6 = por %p245_p3, %p47_p0  ;;  %p252_p7 = scmp.lt.s32.totalorder %s3044_s12, 5 }
  0x10   : > { %s4228_s15 = scalar_select %p3138_p4, 1, 0 }
  0x11   : > { %s4229_s16 = scalar_select %p3143_p6, 1, 0 }
  0x12   : > { %p3148_p8 = pnand %p2044_p5, %p252_p7  ;;  %s3046_s18 = smov [#allocation5]  }
  0x13   : > { %s264_s19 = sshll.u32 %s3046_s18, 4  ;;  %s3047_s21 = smov [#allocation8]   ;;  %s265_s19 = int_to_ptr.vmem [resolvable:$true] %s264_s19 }
  0x14   : > { %s4230_s17 = scalar_select %p3148_p8, 1, 0 }
  0x15   : > { %p2767_p9 = pneg %p3148_p8  ;;  %s296_s22 = sshll.u32 %s3047_s21, 4  ;;  %s297_s22 = int_to_ptr.vmem [resolvable:$true] %s296_s22 }
  0x16   : > { %s3048_s23 = smov [#allocation7]   ;;  %s2851_s25 = scalar_lea.vmem %s265_s19, 2048 }
  0x17   : > { %p3156_p10 = pnand %p2767_p9, %p4221_p1  ;;  %s280_s24 = sshll.u32 %s3048_s23, 4  ;;  %s281_s24 = int_to_ptr.vmem [resolvable:$true] %s280_s24 }
  0x18   : > { %p2852_p12 = scmp.ne.s32.totalorder %s265_s19, %s2851_s25  ;;  %p2859_p3 = scmp.lt.s32.totalorder %s265_s19, %s265_s19 }
  0x19   : > { %p2842_p11 = pneg %p3156_p10  ;;  %p2860_p5 = scmp.lt.s32.totalorder %s2851_s25, %s2851_s25 }
  0x1b   : > { %p2854_p13 = pnand %p2852_p12, %p2842_p11  ;;  %p2861_p7 = por %p2860_p5, %p2859_p3 }
  0x1d   : > { %p2855_p0 = pneg %p2854_p13 }
  0x1f   : > { %p2862_p9 = pnand %p2861_p7, %p2855_p0 }
  0x21   : > { %2865 = shalt.err (!%p2862_p9)
}
  0x22   : > { %s3049_s26 = smov 128   ;;  %s3050_s27 = smov 8  }
  0x23   : > { %s4232_s1 = sld [smem:[#allocation33_spill]]  ;;  %s2877_s14 = scalar_lea.vmem %s297_s22, 2048 }
  0x24   : > { %p2878_p12 = scmp.ne.s32.totalorder %s297_s22, %s2877_s14  ;;  %p2885_p0 = scmp.lt.s32.totalorder %s297_s22, %s297_s22 }
  0x25   : > { %p2886_p5 = scmp.lt.s32.totalorder %s2877_s14, %s2877_s14 }
  0x26   : > { %p2880_p13 = pnand %p2878_p12, %p2842_p11 }
  0x27   : > { %p2887_p7 = por %p2886_p5, %p2885_p0 }
  0x28   : > { %p2881_p3 = pneg %p2880_p13 }
  0x29   : > { %2770 = dma.hbm_to_vmem [thread:$0]  (!%p3156_p10), %s4232_s1, 2048, %s265_s19, [#allocation6], %s3049_s26, %s3049_s26, %s3050_s27  }
  0x2a   : > { %p2888_p9 = pnand %p2887_p7, %p2881_p3 }
  0x2c   : > { %2891 = shalt.err (!%p2888_p9)
}
  0x2d   : > { %s4233_s5 = sld [smem:[#allocation35_spill]]  ;;  %s2903_s19 = scalar_lea.vmem %s281_s24, 2048 }
  0x2e   : > { %p2904_p1 = scmp.ne.s32.totalorder %s281_s24, %s2903_s19  ;;  %p2911_p0 = scmp.lt.s32.totalorder %s281_s24, %s281_s24 }
  0x2f   : > { %p2912_p3 = scmp.lt.s32.totalorder %s2903_s19, %s2903_s19 }
  0x30   : > { %p2906_p12 = pnand %p2904_p1, %p2842_p11 }
  0x31   : > { %p2913_p5 = por %p2912_p3, %p2911_p0 }
  0x32   : > { %p2907_p13 = pneg %p2906_p12 }
  0x33   : > { %2776 = dma.hbm_to_vmem [thread:$0]  (!%p3156_p10), %s4233_s5, 2048, %s297_s22, [#allocation9], %s3049_s26, %s3049_s26, %s3050_s27  }
  0x34   : > { %p2914_p7 = pnand %p2913_p5, %p2907_p13 }
  0x36   : > { %2917 = shalt.err (!%p2914_p7)
}
  0x37   : > { %s4234_s3 = sld [smem:[#allocation34_spill]]  ;;  %s3051_s22 = smov [#allocation10]  }
  0x38   : > { %s312_s28 = sshll.u32 %s3051_s22, 4  ;;  %s313_s28 = int_to_ptr.vmem [resolvable:$true] %s312_s28 }
  0x39   : > { %s2929_s29 = scalar_lea.vmem %s313_s28, 2048  ;;  %p2937_p13 = scmp.lt.s32.totalorder %s313_s28, %s313_s28 }
  0x3a   : > { %p2930_p1 = scmp.ne.s32.totalorder %s313_s28, %s2929_s29  ;;  %p2938_p0 = scmp.lt.s32.totalorder %s2929_s29, %s2929_s29 }
  0x3c   : > { %p2932_p9 = pnand %p2930_p1, %p2842_p11  ;;  %p2939_p3 = por %p2938_p0, %p2937_p13 }
  0x3d   : > { %2773 = dma.hbm_to_vmem [thread:$0]  (!%p3156_p10), %s4234_s3, 2048, %s281_s24, [#allocation6], %s3049_s26, %s3049_s26, %s3050_s27  }
  0x3e   : > { %p2933_p12 = pneg %p2932_p9 }
  0x40   : > { %p2940_p5 = pnand %p2939_p3, %p2933_p12 }
  0x42   : > { %2943 = shalt.err (!%p2940_p5)
}
  0x43   : > { %2779 = dma.hbm_to_vmem [thread:$0]  (!%p3156_p10), %s4218_s7, 2048, %s313_s28, [#allocation9], %s3049_s26, %s3049_s26, %s3050_s27  }
  0x44   : > { %s3207_s18 = sadd.s32 1, %s3044_s12   ;;  %s34_s20 = sadd.s32 1, %s3040_s11 }
  0x45   : > { %s31_s21 = ssub.s32 %s3044_s12, %s3207_s18  ;;  %p41_p11 = scmp.ne.s32.totalorder %s3040_s11, %s3036_s10 }
  0x46   : > { %p32_p7 = scmp.eq.s32.totalorder %s31_s21, 0  ;;  %p42_p1 = scmp.eq.s32.totalorder %s3044_s12, 0 }
  0x47   : > { %p3217_p9 = por %p239_p2, %p41_p11  ;;  %p2792_p12 = scmp.lt.s32.totalorder %s3044_s12, 4 }
  0x48   : > { %s3223_s23 = scalar_select %p32_p7, %s3040_s11, %s34_s20  }
  0x49   : > { %s4235_s19 = scalar_select %p3217_p9, 1, 0 }
  0x4a   : > { %p43_p13 = por %p42_p1, %p41_p11  ;;  %s329_s25 = sand.u32 1, %s3040_s11  }
  0x4b   : > { %s2050_s22 = sshll.u32 %s329_s25, 9  ;;  %s2072_s26 = sshll.u32 %s3044_s12, 13 }
  0x4c   : > { %s3230_s29 = scalar_lea.hbm %s4211_s0, %s2072_s26  ;;  %s333_s24 = scalar_lea.vmem [#allocation2], %s2050_s22 }
  0x4d   : > { %s341_s14 = sshll.u32 %s333_s24, 4  ;;  %p3234_p2 = pnand %p2792_p12, %p43_p13  ;;  %s3232_s14 = int_to_ptr.vmem [resolvable:$true] %s341_s14 }
  0x4e   : > { %s3238_s20 = scalar_lea.sflag [#allocation3], %s329_s25  ;;  %s2944_s1 = scalar_lea.hbm %s3230_s29, 8192 }
  0x4f   : > { %p2945_p10 = scmp.ne.s32.totalorder %s3230_s29, %s2944_s1  ;;  %p2946_p0 = pneg %p3234_p2 }
  0x50   : > { %s2949_s22 = scalar_lea.hbm %s4211_s0, 32768  ;;  %p2950_p11 = scmp.lt.s32.totalorder %s3230_s29, %s4211_s0 }
  0x51   : > { %p2947_p3 = pnand %p2946_p0, %p2945_p10  ;;  %p2951_p7 = scmp.lt.s32.totalorder %s2949_s22, %s2944_s1 }
  0x53   : > { %p2948_p5 = pneg %p2947_p3  ;;  %p2952_p1 = por %p2951_p7, %p2950_p11 }
  0x55   : > { %p2953_p12 = pnand %p2952_p1, %p2948_p5 }
  0x57   : > { %2956 = shalt.err (!%p2953_p12)
}
  0x58   : > { %s2957_s25 = scalar_lea.vmem %s3232_s14, 8192  ;;  %s3052_s3 = smov [#allocation2]  }
  0x59   : > { %p2958_p13 = scmp.ne.s32.totalorder %s3232_s14, %s2957_s25  ;;  %s2962_s5 = sshll.u32 %s3052_s3, 4  ;;  %s2963_s5 = int_to_ptr.vmem [resolvable:$false] %s2962_s5 }
  0x5a   : > { %s2964_s26 = scalar_lea.vmem %s2963_s5, 16384  ;;  %p2965_p3 = scmp.lt.s32.totalorder %s3232_s14, %s2963_s5 }
  0x5b   : > { %p2960_p6 = pnand %p2958_p13, %p2946_p0  ;;  %p2966_p9 = scmp.lt.s32.totalorder %s2964_s26, %s2957_s25 }
  0x5d   : > { %p2961_p10 = pneg %p2960_p6  ;;  %p2967_p4 = por %p2966_p9, %p2965_p3 }
  0x5f   : > { %p2968_p8 = pnand %p2967_p4, %p2961_p10 }
  0x61   : > { %2971 = shalt.err (!%p2968_p8)
}
  0x62   : > { %s3053_s1 = smov 256   ;;  %s3054_s27 = smov 16  }
  0x63   : > { %2783 = dma.hbm_to_vmem [thread:$0]  (!%p3234_p2), %s3230_s29, 8192, %s3232_s14, %s3238_s20, %s3053_s1, %s3053_s1, %s3054_s27  }
  0x64   : > { %p4237_p0 = scmp.ne.s32.totalorder %s4230_s17, 0 }
  0x66   : > { %353 = sbr.rel (%p4237_p0) target bundleno = 853 (0x355), region = 56 }
  0x6b   : > { %s3262_s3 = sand.u32 1, %s3036_s10   ;;  %p4238_p4 = scmp.ne.s32.totalorder %s4228_s15, 0 }
  0x6c   : > { %s2055_s5 = sshll.u32 %s3262_s3, 9  ;;  %s356_s22 = scalar_lea.sflag [#allocation3], %s3262_s3 }
  0x6d   : > { %s3268_s28 = scalar_lea.vmem [#allocation2], %s2055_s5 }
  0x6e   : > { %3015 = dma.done.wait (%p4238_p4), %s356_s22, 8192  }
  0x6f   : > { %3017 = vsyncadd (%p4238_p4), %s356_s22, 4294959104  ;;  %p4239_p6 = scmp.eq.s32.totalorder %s3129_s13, 0 }
  0x71   : > { %3019 = dma.done.wait (%p4239_p6), [#allocation6], 4096   ;;  %p4240_p8 = pmov %p4239_p6 }
  0x72   : > { %p4241_p9 = pmov %p4239_p6 }
  0x73   : > { %3021 = vsyncadd (%p4240_p8), [#allocation6], 4294963200 }
  0x74   : > { %3023 = dma.done.wait (%p4241_p9), [#allocation9], 4096   ;;  %p4242_p2 = pmov %p4239_p6 }
  0x75   : > { %v3282_v0 = vld [vmem:[#allocation5 + $0x78] sm:$0xff]  ;;  %v3284_v1 = vld [vmem:[#allocation5 + $0x70] sm:$0xff]  ;;  %v3289_v2 = vld [vmem:[#allocation5 + $0x68] sm:$0xff]  ;;  %s3950_s26 = scalar_lea.vmem [#allocation11], %s2055_s5  ;;  %s2074_s1 = sshll.u32 %s3129_s13, 13 }
  0x76   : > { %3025 = vsyncadd (%p4242_p2), [#allocation9], 4294963200  ;;  %2315 = vmatprep.subr.mxu0 %v3282_v0  ;;  %2715 = vmatprep.subr.mxu1 %v3282_v0  ;;  %v3295_v3 = vld [vmem:[#allocation5 + $0x60] sm:$0xff]  ;;  %v3304_v5 = vld [vmem:[#allocation5 + $0x58] sm:$0xff]  ;;  %s1932_s27 = sshll.u32 %s3950_s26, 4  ;;  %s4163_s22 = scalar_lea.hbm %s4220_s9, %s2074_s1  ;;  %s4165_s27 = int_to_ptr.vmem [resolvable:$true] %s1932_s27 }
  0x77   : > { %2316 = vmatpush3.msra.mxu0 %v3282_v0  ;;  %2731 = vmatpush3.msra.mxu1 %v3282_v0  ;;  %v3300_v4 = vld [vmem:[%s3268_s28] sm:$0xff]  ;;  %v3310_v6 = vld [vmem:[#allocation5 + $0x50] sm:$0xff]  ;;  %v3316_v7 = vld [vmem:[#allocation5 + $0x48] sm:$0xff]  ;;  %s2972_s15 = scalar_lea.vmem %s4165_s27, 8192  ;;  %p4277_p11 = scmp.ne.s32.totalorder %s4235_s19, 0 }
  0x78   : > { %2317 = vmatprep.subr.mxu0 %v3284_v1  ;;  %2716 = vmatprep.subr.mxu1 %v3284_v1  ;;  %v3322_v8 = vld [vmem:[#allocation5 + $0x40] sm:$0xff]  ;;  %v3328_v9 = vld [vmem:[#allocation5 + $0x38] sm:$0xff]  ;;  %v3334_v10 = vld [vmem:[#allocation5 + $0x30] sm:$0xff]  ;;  %p2973_p5 = scmp.ne.s32.totalorder %s4165_s27, %s2972_s15  ;;  %s3055_s17 = smov [#allocation11]  }
  0x79   : > { %2318 = vmatpush3.msra.mxu0 %v3284_v1  ;;  %2732 = vmatpush3.msra.mxu1 %v3284_v1  ;;  %v3340_v11 = vld [vmem:[#allocation5 + $0x28] sm:$0xff]  ;;  %v3346_v12 = vld [vmem:[#allocation5 + $0x20] sm:$0xff]  ;;  %v3352_v13 = vld [vmem:[#allocation5 + $0x18] sm:$0xff]  ;;  %s2976_s29 = sshll.u32 %s3055_s17, 4  ;;  %s2977_s29 = int_to_ptr.vmem [resolvable:$false] %s2976_s29 }
  0x7a   : > { %2319 = vmatprep.subr.mxu0 %v3289_v2  ;;  %2717 = vmatprep.subr.mxu1 %v3289_v2  ;;  %v3358_v14 = vld [vmem:[#allocation5 + $0x10] sm:$0xff]  ;;  %v3364_v15 = vld [vmem:[#allocation5 + $0x8] sm:$0xff]  ;;  %v3370_v16 = vld [vmem:[#allocation5] sm:$0xff]  ;;  %p2974_p7 = pnand %p2973_p5, %p4277_p11  ;;  %s2978_s14 = scalar_lea.vmem %s2977_s29, 16384 }
  0x7b   : > { %2320 = vmatpush3.msra.mxu0 %v3289_v2  ;;  %2347 = vmatprep.mubr.f32.mxu0 %v3300_v4  ;;  %v3377_v17 = vld [vmem:[%s3268_s28 + $0x10] sm:$0xff]  ;;  %v1028_v18 = vld [vmem:[#allocation7 + $0x78] sm:$0xff]  ;;  %v3382_v19 = vld [vmem:[%s3268_s28 + $0x20] sm:$0xff]  ;;  %p2979_p12 = scmp.lt.s32.totalorder %s4165_s27, %s2977_s29  ;;  %p2980_p13 = scmp.lt.s32.totalorder %s2978_s14, %s2972_s15 }
  0x7c   : > { %2321 = vmatprep.subr.mxu0 %v3295_v3  ;;  %2733 = vmatpush3.msra.mxu1 %v3289_v2  ;;  %v1027_v20 = vld [vmem:[#allocation7 + $0x70] sm:$0xff]  ;;  %v1026_v22 = vld [vmem:[#allocation7 + $0x68] sm:$0xff]  ;;  %v3393_v23 = vld [vmem:[%s3268_s28 + $0x40] sm:$0xff]  ;;  %p2975_p1 = pneg %p2974_p7 }
  0x7d   : > { %2322 = vmatpush3.msra.mxu0 %v3295_v3  ;;  %2718 = vmatprep.subr.mxu1 %v3295_v3  ;;  %v3390_v21 = vld [vmem:[%s3268_s28 + $0x30] sm:$0xff]  ;;  %v3396_v24 = vld [vmem:[%s3268_s28 + $0x100] sm:$0xff]  ;;  %v1024_v27 = vld [vmem:[#allocation7 + $0x58] sm:$0xff]  ;;  %p2981_p10 = por %p2980_p13, %p2979_p12 }
  0x7e   : > { %2323 = vmatprep.subr.mxu0 %v3304_v5  ;;  %2734 = vmatpush3.msra.mxu1 %v3295_v3  ;;  %v1025_v25 = vld [vmem:[#allocation7 + $0x60] sm:$0xff]  ;;  %v3403_v26 = vld [vmem:[%s3268_s28 + $0x50] sm:$0xff]  ;;  %v1022_v32 = vld [vmem:[#allocation7 + $0x48] sm:$0xff] }
  0x7f   : > { %2324 = vmatpush3.msra.mxu0 %v3304_v5  ;;  %2719 = vmatprep.subr.mxu1 %v3304_v5  ;;  %v3406_v28 = vld [vmem:[%s3268_s28 + $0x110] sm:$0xff]  ;;  %v3409_v29 = vld [vmem:[%s3268_s28 + $0x60] sm:$0xff]  ;;  %v1020_v36 = vld [vmem:[#allocation7 + $0x38] sm:$0xff]  ;;  %p2982_p3 = pnand %p2981_p10, %p2975_p1 }
  0x80   : > { %2325 = vmatprep.subr.mxu0 %v3310_v6  ;;  %2735 = vmatpush3.msra.mxu1 %v3304_v5  ;;  %v1023_v30 = vld [vmem:[#allocation7 + $0x50] sm:$0xff]  ;;  %v3419_v33 = vld [vmem:[%s3268_s28 + $0x80] sm:$0xff]  ;;  %v1018_v41 = vld [vmem:[#allocation7 + $0x28] sm:$0xff] }
  0x81   : > { %2326 = vmatpush3.msra.mxu0 %v3310_v6  ;;  %2720 = vmatprep.subr.mxu1 %v3310_v6  ;;  %v3416_v31 = vld [vmem:[%s3268_s28 + $0x70] sm:$0xff]  ;;  %v1021_v34 = vld [vmem:[#allocation7 + $0x40] sm:$0xff]  ;;  %v3445_v43 = vld [vmem:[%s3268_s28 + $0x8] sm:$0xff] }
  0x82   : > { %2327 = vmatprep.subr.mxu0 %v3316_v7  ;;  %2736 = vmatpush3.msra.mxu1 %v3310_v6  ;;  %v3426_v35 = vld [vmem:[%s3268_s28 + $0x90] sm:$0xff]  ;;  %v3429_v37 = vld [vmem:[%s3268_s28 + $0x120] sm:$0xff]  ;;  %v476_v46 = vadd.f32 %v3445_v43, %v3300_v4  ;;  %v3456_v47 = vld [vmem:[%s3268_s28 + $0x18] sm:$0xff] }
  0x83   : > { %2328 = vmatpush3.msra.mxu0 %v3316_v7  ;;  %2721 = vmatprep.subr.mxu1 %v3316_v7  ;;  %v3432_v38 = vld [vmem:[%s3268_s28 + $0xa0] sm:$0xff]  ;;  %v1019_v39 = vld [vmem:[#allocation7 + $0x30] sm:$0xff]  ;;  %v1016_v49 = vld [vmem:[#allocation7 + $0x18] sm:$0xff]  ;;  %v477_v53 = vadd.f32 %v3456_v47, %v3377_v17 }
  0x84   : > { %2329 = vmatprep.subr.mxu0 %v3322_v8  ;;  %2737 = vmatpush3.msra.mxu1 %v3316_v7  ;;  %v3439_v40 = vld [vmem:[%s3268_s28 + $0xb0] sm:$0xff]  ;;  %v3448_v44 = vld [vmem:[%s3268_s28 + $0xc0] sm:$0xff]  ;;  %v3463_v50 = vld [vmem:[%s3268_s28 + $0x28] sm:$0xff]  ;;  %v508_v55 = vmul.f32 0.5, %v476_v46 }
  0x85   : > { %2330 = vmatpush3.msra.mxu0 %v3322_v8  ;;  %2722 = vmatprep.subr.mxu1 %v3322_v8  ;;  %v3442_v42 = vld [vmem:[%s3268_s28 + $0x130] sm:$0xff]  ;;  %v1017_v45 = vld [vmem:[#allocation7 + $0x20] sm:$0xff]  ;;  %v3473_v54 = vld [vmem:[%s3268_s28 + $0x38] sm:$0xff]  ;;  %v478_v56 = vadd.f32 %v3463_v50, %v3382_v19  ;;  %v509_v62 = vmul.f32 0.5, %v477_v53 }
  0x86   : > { %2331 = vmatprep.subr.mxu0 %v3328_v9  ;;  %2738 = vmatpush3.msra.mxu1 %v3322_v8  ;;  %v3460_v48 = vld [vmem:[%s3268_s28 + $0xd0] sm:$0xff]  ;;  %v3466_v51 = vld [vmem:[%s3268_s28 + $0xe0] sm:$0xff]  ;;  %v1014_v58 = vld [vmem:[#allocation7 + $0x8] sm:$0xff]  ;;  %v479_v63 = vadd.f32 %v3473_v54, %v3390_v21 }
  0x87   : > { %2332 = vmatpush3.msra.mxu0 %v3328_v9  ;;  %2723 = vmatprep.subr.mxu1 %v3328_v9  ;;  %v1015_v52 = vld [vmem:[#allocation7 + $0x10] sm:$0xff]  ;;  %v3483_v59 = vld [vmem:[%s3268_s28 + $0x140] sm:$0xff]  ;;  %v3486_v60 = vld [vmem:[%s3268_s28 + $0x48] sm:$0xff] }
  0x88   : > { %2333 = vmatprep.subr.mxu0 %v3334_v10  ;;  %2739 = vmatpush3.msra.mxu1 %v3328_v9  ;;  %v3480_v57 = vld [vmem:[%s3268_s28 + $0xf0] sm:$0xff]  ;;  %v1013_v61 = vld [vmem:[#allocation7] sm:$0xff] }
  0x89   : > { %2334 = vmatpush3.msra.mxu0 %v3334_v10  ;;  %2724 = vmatprep.subr.mxu1 %v3334_v10  ;;  %v3499_v4 = vld [vmem:[%s3268_s28 + $0x150] sm:$0xff] }
  0x8a   : > { %2335 = vmatprep.subr.mxu0 %v3340_v11  ;;  %2740 = vmatpush3.msra.mxu1 %v3334_v10 }
  0x8b   : > { %2336 = vmatpush3.msra.mxu0 %v3340_v11  ;;  %2725 = vmatprep.subr.mxu1 %v3340_v11 }
  0x8c   : > { %2337 = vmatprep.subr.mxu0 %v3346_v12  ;;  %2741 = vmatpush3.msra.mxu1 %v3340_v11 }
  0x8d   : > { %2338 = vmatpush3.msra.mxu0 %v3346_v12  ;;  %2726 = vmatprep.subr.mxu1 %v3346_v12 }
  0x8e   : > { %2339 = vmatprep.subr.mxu0 %v3352_v13  ;;  %2742 = vmatpush3.msra.mxu1 %v3346_v12 }
  0x8f   : > { %2340 = vmatpush3.msra.mxu0 %v3352_v13  ;;  %2727 = vmatprep.subr.mxu1 %v3352_v13 }
  0x90   : > { %2341 = vmatprep.subr.mxu0 %v3358_v14  ;;  %2743 = vmatpush3.msra.mxu1 %v3352_v13 }
  0x91   : > { %2342 = vmatpush3.msra.mxu0 %v3358_v14  ;;  %2728 = vmatprep.subr.mxu1 %v3358_v14 }
  0x92   : > { %2343 = vmatprep.subr.mxu0 %v3364_v15  ;;  %2744 = vmatpush3.msra.mxu1 %v3358_v14 }
  0x93   : > { %2344 = vmatpush3.msra.mxu0 %v3364_v15  ;;  %2729 = vmatprep.subr.mxu1 %v3364_v15 }
  0x94   : > { %2345 = vmatprep.subr.mxu0 %v3370_v16  ;;  %2745 = vmatpush3.msra.mxu1 %v3364_v15 }
  0x95   : > { %2346 = vmatpush3.msra.mxu0 %v3370_v16  ;;  %2730 = vmatprep.subr.mxu1 %v3370_v16 }
  0x96   : > { %2348 = vmatmul.mubr.f32.vlgmr.msra.gmra.mxu0 %v3377_v17  ;;  %2475 = vmatprep.subr.mxu0 %v1028_v18  ;;  %v511_v17 = vmul.f32 0.5, %v479_v63 }
  0x97   : > { %2476 = vmatpush3.msra.mxu0 %v1028_v18  ;;  %2350 = vmatprep.mubr.f32.mxu0 %v3382_v19 }
  0x98   : > { %2477 = vmatprep.subr.mxu0 %v1027_v20  ;;  %2746 = vmatpush3.msra.mxu1 %v3370_v16 }
  0x99   : > { %2478 = vmatpush3.msra.mxu0 %v1027_v20  ;;  %2371 = vmatprep.mubr.f32.mxu1 %v3396_v24 }
  0x9a   : > { %2351 = vmatmul.mubr.f32.gmra.mxu0 %v3390_v21  ;;  %2479 = vmatprep.subr.mxu0 %v1026_v22  ;;  %v3512_v21 = vld [vmem:[%s3268_s28 + $0x78] sm:$0xff] }
  0x9b   : > { %2480 = vmatpush3.msra.mxu0 %v1026_v22  ;;  %2353 = vmatprep.mubr.f32.mxu0 %v3393_v23  ;;  %v3515_v22 = vld [vmem:[%s3268_s28 + $0x160] sm:$0xff] }
  0x9c   : > { %2481 = vmatprep.subr.mxu0 %v1025_v25  ;;  %2372 = vmatmul.mubr.f32.vlgmr.msra.gmra.mxu1 %v3406_v28 }
  0x9d   : > { %2482 = vmatpush3.msra.mxu0 %v1025_v25  ;;  %2395 = vmatprep.subr.mxu1 %v3282_v0  ;;  %v3522_v25 = vld [vmem:[%s3268_s28 + $0x170] sm:$0xff] }
  0x9e   : > { %2354 = vmatmul.mubr.f32.gmra.mxu0 %v3403_v26  ;;  %2483 = vmatprep.subr.mxu0 %v1024_v27 }
  0x9f   : > { %2484 = vmatpush3.msra.mxu0 %v1024_v27  ;;  %2356 = vmatprep.mubr.f32.mxu0 %v3409_v29 }
  0xa0   : > { %2485 = vmatprep.subr.mxu0 %v1023_v30  ;;  %2396 = vmatpush3.msra.mxu1 %v3282_v0  ;;  %v510_v0 = vmul.f32 0.5, %v478_v56  ;;  %v3600_v56 = vld [vmem:[%s3268_s28 + $0xf8] sm:$0xff] }
  0xa1   : > { %2486 = vmatpush3.msra.mxu0 %v1023_v30  ;;  %2397 = vmatprep.subr.mxu1 %v3284_v1  ;;  %v3534_v30 = vld [vmem:[%s3268_s28 + $0x98] sm:$0xff] }
  0xa2   : > { %2357 = vmatmul.mubr.f32.gmra.mxu0 %v3416_v31  ;;  %2487 = vmatprep.subr.mxu0 %v1022_v32 }
  0xa3   : > { %2488 = vmatpush3.msra.mxu0 %v1022_v32  ;;  %2359 = vmatprep.mubr.f32.mxu0 %v3419_v33  ;;  %v3541_v32 = vld [vmem:[%s3268_s28 + $0xa8] sm:$0xff] }
  0xa4   : > { %2489 = vmatprep.subr.mxu0 %v1021_v34  ;;  %2374 = vmatprep.mubr.f32.mxu1 %v3429_v37 }
  0xa5   : > { %2490 = vmatpush3.msra.mxu0 %v1021_v34  ;;  %2398 = vmatpush3.msra.mxu1 %v3284_v1  ;;  %v480_v1 = vadd.f32 %v3486_v60, %v3393_v23  ;;  %v3519_v23 = vld [vmem:[%s3268_s28 + $0x88] sm:$0xff] }
  0xa6   : > { %2360 = vmatmul.mubr.f32.gmra.mxu0 %v3426_v35  ;;  %2491 = vmatprep.subr.mxu0 %v1020_v36 }
  0xa7   : > { %2492 = vmatpush3.msra.mxu0 %v1020_v36  ;;  %2362 = vmatprep.mubr.f32.mxu0 %v3432_v38  ;;  %v512_v19 = vmul.f32 0.5, %v480_v1  ;;  %v486_v36 = vadd.f32 %v3541_v32, %v3432_v38 }
  0xa8   : > { %2493 = vmatprep.subr.mxu0 %v1019_v39  ;;  %2375 = vmatmul.mubr.f32.gmra.mxu1 %v3442_v42 }
  0xa9   : > { %2494 = vmatpush3.msra.mxu0 %v1019_v39  ;;  %2399 = vmatprep.subr.mxu1 %v3289_v2  ;;  %v3556_v39 = vld [vmem:[%s3268_s28 + $0xb8] sm:$0xff] }
  0xaa   : > { %2363 = vmatmul.mubr.f32.gmra.mxu0 %v3439_v40  ;;  %2495 = vmatprep.subr.mxu0 %v1018_v41  ;;  %v487_v38 = vadd.f32 %v3556_v39, %v3439_v40  ;;  %v3588_v40 = vld [vmem:[%s3268_s28 + $0x1d0] sm:$0xff] }
  0xab   : > { %2496 = vmatpush3.msra.mxu0 %v1018_v41  ;;  %2365 = vmatprep.mubr.f32.mxu0 %v3448_v44  ;;  %v3563_v41 = vld [vmem:[%s3268_s28 + $0xc8] sm:$0xff] }
  0xac   : > { %2497 = vmatprep.subr.mxu0 %v1017_v45  ;;  %2400 = vmatpush3.msra.mxu1 %v3289_v2  ;;  %v3496_v2 = vld [vmem:[%s3268_s28 + $0x58] sm:$0xff]  ;;  %v488_v46 = vadd.f32 %v3563_v41, %v3448_v44 }
  0xad   : > { %2498 = vmatpush3.msra.mxu0 %v1017_v45  ;;  %2401 = vmatprep.subr.mxu1 %v3295_v3  ;;  %v481_v18 = vadd.f32 %v3496_v2, %v3403_v26  ;;  %v483_v26 = vadd.f32 %v3512_v21, %v3416_v31  ;;  %v3544_v31 = vld [vmem:[%s3268_s28 + $0x190] sm:$0xff]  ;;  %v518_v45 = vmul.f32 0.5, %v486_v36 }
  0xae   : > { %2366 = vmatmul.mubr.f32.gmra.mxu0 %v3460_v48  ;;  %2499 = vmatprep.subr.mxu0 %v1016_v49  ;;  %v520_v53 = vmul.f32 0.5, %v488_v46  ;;  %v3696_v46 = vld [vmem:[%s3268_s28 + $0x1d8] sm:$0xff] }
  0xaf   : > { %2500 = vmatpush3.msra.mxu0 %v1016_v49  ;;  %2368 = vmatprep.mubr.f32.mxu0 %v3466_v51  ;;  %v3578_v49 = vld [vmem:[%s3268_s28 + $0xd8] sm:$0xff] }
  0xb0   : > { %2501 = vmatprep.subr.mxu0 %v1015_v52  ;;  %2377 = vmatprep.mubr.f32.mxu1 %v3483_v59  ;;  %v489_v44 = vadd.f32 %v3578_v49, %v3460_v48  ;;  %v491_v48 = vadd.f32 %v3600_v56, %v3480_v57 }
  0xb1   : > { %2502 = vmatpush3.msra.mxu0 %v1015_v52  ;;  %2402 = vmatpush3.msra.mxu1 %v3295_v3  ;;  %v3502_v3 = vld [vmem:[%s3268_s28 + $0x68] sm:$0xff] }
  0xb2   : > { %2369 = vmatmul.mubr.f32.gmra.mxu0 %v3480_v57  ;;  %2503 = vmatprep.subr.mxu0 %v1014_v58  ;;  %v482_v20 = vadd.f32 %v3502_v3, %v3409_v29  ;;  %v484_v29 = vadd.f32 %v3519_v23, %v3419_v33  ;;  %v485_v33 = vadd.f32 %v3534_v30, %v3426_v35  ;;  %v3566_v35 = vld [vmem:[%s3268_s28 + $0x1b0] sm:$0xff]  ;;  %v3585_v52 = vld [vmem:[%s3268_s28 + $0xe8] sm:$0xff]  ;;  %v523_v57 = vmul.f32 0.5, %v491_v48 }
  0xb3   : > { %2504 = vmatpush3.msra.mxu0 %v1014_v58  ;;  %2507 = vmatprep.mubr.f32.mxu0 %v508_v55  ;;  %v490_v55 = vadd.f32 %v3585_v52, %v3466_v51  ;;  %v3603_v58 = vld [vmem:[%s3268_s28 + $0x1e0] sm:$0xff]  ;;  %v1276_v51 = vld [vmem:[#allocation8 + $0x78] sm:$0xff]  ;;  %v1262_v48 = vld [vmem:[#allocation8 + $0x8] sm:$0xff] }
  0xb4   : > { %2505 = vmatprep.subr.mxu0 %v1013_v61  ;;  %2378 = vmatmul.mubr.f32.gmra.mxu1 %v3499_v4  ;;  %v514_v27 = vmul.f32 0.5, %v482_v20  ;;  %v516_v34 = vmul.f32 0.5, %v484_v29  ;;  %v3652_v20 = vld [vmem:[%s3268_s28 + $0x168] sm:$0xff] }
  0xb5   : > { %2506 = vmatpush3.msra.mxu0 %v1013_v61  ;;  %2403 = vmatprep.subr.mxu1 %v3304_v5  ;;  %v3610_v61 = vld [vmem:[%s3268_s28 + $0x1f0] sm:$0xff] }
  0xb6   : > { %2508 = vmatmul.mubr.f32.vlgmr.msra.gmra.mxu0 %v509_v62  ;;  %2404 = vmatpush3.msra.mxu1 %v3304_v5  ;;  %v513_v5 = vmul.f32 0.5, %v481_v18  ;;  %v522_v62 = vmul.f32 0.5, %v490_v55 }
  0xb7   : > { %2510 = vmatprep.mubr.f32.mxu0 %v510_v0  ;;  %2405 = vmatprep.subr.mxu1 %v3310_v6  ;;  %v3622_v0 = vld [vmem:[%s3268_s28 + $0x118] sm:$0xff] }
  0xb8   : > { %2380 = vmatprep.mubr.f32.mxu1 %v3515_v22  ;;  %2406 = vmatpush3.msra.mxu1 %v3310_v6  ;;  %v3537_v6 = vld [vmem:[%s3268_s28 + $0x180] sm:$0xff] }
  0xb9   : > { %2381 = vmatmul.mubr.f32.gmra.mxu1 %v3522_v25  ;;  %2407 = vmatprep.subr.mxu1 %v3316_v7 }
  0xba   : > { %2511 = vmatmul.mubr.f32.gmra.mxu0 %v511_v17  ;;  %2408 = vmatpush3.msra.mxu1 %v3316_v7  ;;  %v515_v7 = vmul.f32 0.5, %v483_v26  ;;  %v498_v26 = vadd.f32 %v3652_v20, %v3515_v22 }
  0xbb   : > { %2513 = vmatprep.mubr.f32.mxu0 %v512_v19  ;;  %2409 = vmatprep.subr.mxu1 %v3322_v8 }
  0xbc   : > { %2383 = vmatprep.mubr.f32.mxu1 %v3537_v6  ;;  %2410 = vmatpush3.msra.mxu1 %v3322_v8  ;;  %v3559_v8 = vld [vmem:[%s3268_s28 + $0x1a0] sm:$0xff]  ;;  %v530_v22 = vmul.f32 0.5, %v498_v26 }
  0xbd   : > { %2384 = vmatmul.mubr.f32.gmra.mxu1 %v3544_v31  ;;  %2411 = vmatprep.subr.mxu1 %v3328_v9 }
  0xbe   : > { %2514 = vmatmul.mubr.f32.gmra.mxu0 %v513_v5  ;;  %2412 = vmatpush3.msra.mxu1 %v3328_v9  ;;  %v517_v9 = vmul.f32 0.5, %v485_v33  ;;  %v3676_v33 = vld [vmem:[%s3268_s28 + $0x1a8] sm:$0xff] }
  0xbf   : > { %2516 = vmatprep.mubr.f32.mxu0 %v514_v27  ;;  %2413 = vmatprep.subr.mxu1 %v3334_v10  ;;  %v3664_v27 = vld [vmem:[%s3268_s28 + $0x188] sm:$0xff]  ;;  %v502_v36 = vadd.f32 %v3676_v33, %v3559_v8 }
  0xc0   : > { %2386 = vmatprep.mubr.f32.mxu1 %v3559_v8  ;;  %2414 = vmatpush3.msra.mxu1 %v3334_v10  ;;  %v3581_v10 = vld [vmem:[%s3268_s28 + $0x1c0] sm:$0xff] }
  0xc1   : > { %2387 = vmatmul.mubr.f32.gmra.mxu1 %v3566_v35  ;;  %2415 = vmatprep.subr.mxu1 %v3340_v11  ;;  %v534_v8 = vmul.f32 0.5, %v502_v36 }
  0xc2   : > { %2517 = vmatmul.mubr.f32.gmra.mxu0 %v515_v7  ;;  %2416 = vmatpush3.msra.mxu1 %v3340_v11  ;;  %v519_v11 = vmul.f32 0.5, %v487_v38  ;;  %v500_v7 = vadd.f32 %v3664_v27, %v3537_v6 }
  0xc3   : > { %2519 = vmatprep.mubr.f32.mxu0 %v516_v34  ;;  %2417 = vmatprep.subr.mxu1 %v3346_v12 }
  0xc4   : > { %2389 = vmatprep.mubr.f32.mxu1 %v3581_v10  ;;  %2418 = vmatpush3.msra.mxu1 %v3346_v12  ;;  %v3607_v12 = vld [vmem:[%s3268_s28 + $0x108] sm:$0xff]  ;;  %v532_v6 = vmul.f32 0.5, %v500_v7 }
  0xc5   : > { %2390 = vmatmul.mubr.f32.gmra.mxu1 %v3588_v40  ;;  %2419 = vmatprep.subr.mxu1 %v3352_v13  ;;  %v492_v63 = vadd.f32 %v3607_v12, %v3396_v24  ;;  %v493_v24 = vadd.f32 %v3622_v0, %v3406_v28 }
  0xc6   : > { %2520 = vmatmul.mubr.f32.gmra.mxu0 %v517_v9  ;;  %2420 = vmatpush3.msra.mxu1 %v3352_v13  ;;  %v521_v13 = vmul.f32 0.5, %v489_v44  ;;  %v3688_v9 = vld [vmem:[%s3268_s28 + $0x1c8] sm:$0xff] }
  0xc7   : > { %2522 = vmatprep.mubr.f32.mxu0 %v518_v45  ;;  %2421 = vmatprep.subr.mxu1 %v3358_v14  ;;  %v524_v1 = vmul.f32 0.5, %v492_v63  ;;  %v525_v28 = vmul.f32 0.5, %v493_v24  ;;  %v504_v45 = vadd.f32 %v3688_v9, %v3581_v10  ;;  %v475_v10 = vld [vmem:[%s3268_s28 + $0x1f8] sm:$0xff]  ;;  %v1555_v63 = vld [vmem:[#allocation10 + $0x70] sm:$0xff]  ;;  %v1550_v24 = vld [vmem:[#allocation10 + $0x48] sm:$0xff] }
  0xc8   : > { %2392 = vmatprep.mubr.f32.mxu1 %v3603_v58  ;;  %2422 = vmatpush3.msra.mxu1 %v3358_v14  ;;  %v3626_v14 = vld [vmem:[%s3268_s28 + $0x128] sm:$0xff]  ;;  %v507_v55 = vadd.f32 %v475_v10, %v3610_v61 }
  0xc9   : > { %2393 = vmatmul.mubr.f32.gmra.mxu1 %v3610_v61  ;;  %2423 = vmatprep.subr.mxu1 %v3364_v15  ;;  %v494_v17 = vadd.f32 %v3626_v14, %v3429_v37  ;;  %v536_v44 = vmul.f32 0.5, %v504_v45  ;;  %v1263_v61 = vld [vmem:[#allocation8 + $0x10] sm:$0xff] }
  0xca   : > { %2523 = vmatmul.mubr.f32.gmra.mxu0 %v519_v11  ;;  %2424 = vmatpush3.msra.mxu1 %v3364_v15  ;;  %v1275_v15 = vld [vmem:[#allocation8 + $0x70] sm:$0xff] }
  0xcb   : > { %2525 = vmatprep.mubr.f32.mxu0 %v520_v53  ;;  %2425 = vmatprep.subr.mxu1 %v3370_v16  ;;  %v526_v37 = vmul.f32 0.5, %v494_v17  ;;  %v1548_v17 = vld [vmem:[#allocation10 + $0x38] sm:$0xff] }
  0xcc   : > { %2426 = vmatpush3.msra.mxu1 %v3370_v16  ;;  %2427 = vmatprep.mubr.f32.mxu1 %v3445_v43  ;;  %v3636_v16 = vld [vmem:[%s3268_s28 + $0x138] sm:$0xff]  ;;  %v3640_v43 = vld [vmem:[%s3268_s28 + $0x148] sm:$0xff] }
  0xcd   : > { %2428 = vmatmul.mubr.f32.vlgmr.msra.gmra.mxu1 %v3456_v47  ;;  %2555 = vmatprep.subr.mxu1 %v1276_v51  ;;  %v1274_v47 = vld [vmem:[#allocation8 + $0x68] sm:$0xff]  ;;  %v495_v18 = vadd.f32 %v3636_v16, %v3442_v42  ;;  %v496_v19 = vadd.f32 %v3640_v43, %v3483_v59 }
  0xce   : > { %2526 = vmatmul.mubr.f32.gmra.mxu0 %v521_v13  ;;  %2556 = vmatpush3.msra.mxu1 %v1276_v51  ;;  %v1261_v51 = vld [vmem:[#allocation8] sm:$0xff] }
  0xcf   : > { %2528 = vmatprep.mubr.f32.mxu0 %v522_v62  ;;  %2430 = vmatprep.mubr.f32.mxu1 %v3463_v50  ;;  %v3648_v50 = vld [vmem:[%s3268_s28 + $0x158] sm:$0xff]  ;;  %v527_v42 = vmul.f32 0.5, %v495_v18  ;;  %v528_v59 = vmul.f32 0.5, %v496_v19  ;;  %v1543_v18 = vld [vmem:[#allocation10 + $0x10] sm:$0xff] }
  0xd0   : > { %2557 = vmatprep.subr.mxu1 %v1275_v15  ;;  %v497_v5 = vadd.f32 %v3648_v50, %v3499_v4  ;;  %v1556_v62 = vld [vmem:[#allocation10 + $0x78] sm:$0xff] }
  0xd1   : > { %2431 = vmatmul.mubr.f32.gmra.mxu1 %v3473_v54  ;;  %v1273_v54 = vld [vmem:[#allocation8 + $0x60] sm:$0xff]  ;;  %2635 = vmatprep.subr.mxu0 %v1556_v62 }
  0xd2   : > { %2529 = vmatmul.mubr.f32.gmra.mxu0 %v523_v57  ;;  %2558 = vmatpush3.msra.mxu1 %v1275_v15  ;;  %v529_v4 = vmul.f32 0.5, %v497_v5  ;;  %v1552_v15 = vld [vmem:[#allocation10 + $0x58] sm:$0xff]  ;;  %v1551_v57 = vld [vmem:[#allocation10 + $0x50] sm:$0xff] }
  0xd3   : > { %2531 = vmatprep.mubr.f32.mxu0 %v524_v1  ;;  %2433 = vmatprep.mubr.f32.mxu1 %v3486_v60  ;;  %v3660_v60 = vld [vmem:[%s3268_s28 + $0x178] sm:$0xff]  ;;  %v1549_v1 = vld [vmem:[#allocation10 + $0x40] sm:$0xff] }
  0xd4   : > { %2559 = vmatprep.subr.mxu1 %v1274_v47  ;;  %v499_v29 = vadd.f32 %v3660_v60, %v3522_v25  ;;  %2636 = vmatpush3.msra.mxu0 %v1556_v62 }
  0xd5   : > { %2434 = vmatmul.mubr.f32.gmra.mxu1 %v3496_v2  ;;  %v1272_v2 = vld [vmem:[#allocation8 + $0x58] sm:$0xff]  ;;  %2637 = vmatprep.subr.mxu0 %v1555_v63 }
  0xd6   : > { %2532 = vmatmul.mubr.f32.gmra.mxu0 %v525_v28  ;;  %2560 = vmatpush3.msra.mxu1 %v1274_v47  ;;  %v531_v25 = vmul.f32 0.5, %v499_v29  ;;  %v1545_v47 = vld [vmem:[#allocation10 + $0x20] sm:$0xff]  ;;  %v1544_v28 = vld [vmem:[#allocation10 + $0x18] sm:$0xff] }
  0xd7   : > { %2534 = vmatprep.mubr.f32.mxu0 %v526_v37  ;;  %2436 = vmatprep.mubr.f32.mxu1 %v3502_v3  ;;  %v3672_v3 = vld [vmem:[%s3268_s28 + $0x198] sm:$0xff] }
  0xd8   : > { %2561 = vmatprep.subr.mxu1 %v1273_v54  ;;  %v501_v34 = vadd.f32 %v3672_v3, %v3544_v31  ;;  %2638 = vmatpush3.msra.mxu0 %v1555_v63 }
  0xd9   : > { %2437 = vmatmul.mubr.f32.gmra.mxu1 %v3512_v21  ;;  %v1271_v21 = vld [vmem:[#allocation8 + $0x50] sm:$0xff] }
  0xda   : > { %2535 = vmatmul.mubr.f32.gmra.mxu0 %v527_v42  ;;  %2562 = vmatpush3.msra.mxu1 %v1273_v54  ;;  %v533_v31 = vmul.f32 0.5, %v501_v34 }
  0xdb   : > { %2537 = vmatprep.mubr.f32.mxu0 %v528_v59  ;;  %2439 = vmatprep.mubr.f32.mxu1 %v3519_v23  ;;  %v3684_v23 = vld [vmem:[%s3268_s28 + $0x1b8] sm:$0xff] }
  0xdc   : > { %2563 = vmatprep.subr.mxu1 %v1272_v2  ;;  %v503_v38 = vadd.f32 %v3684_v23, %v3566_v35  ;;  %v505_v35 = vadd.f32 %v3696_v46, %v3588_v40  ;;  %v1267_v40 = vld [vmem:[#allocation8 + $0x30] sm:$0xff] }
  0xdd   : > { %2440 = vmatmul.mubr.f32.gmra.mxu1 %v3534_v30  ;;  %v1270_v30 = vld [vmem:[#allocation8 + $0x48] sm:$0xff] }
  0xde   : > { %2538 = vmatmul.mubr.f32.gmra.mxu0 %v529_v4  ;;  %2564 = vmatpush3.msra.mxu1 %v1272_v2  ;;  %v535_v11 = vmul.f32 0.5, %v503_v38 }
  0xdf   : > { %2540 = vmatprep.mubr.f32.mxu0 %v530_v22  ;;  %2442 = vmatprep.mubr.f32.mxu1 %v3541_v32  ;;  %v473_v32 = vld [vmem:[%s3268_s28 + $0x1e8] sm:$0xff]  ;;  %s1918_s28 = scalar_lea.sflag [#allocation4], %s3262_s3 }
  0xe0   : > { %2565 = vmatprep.subr.mxu1 %v1271_v21  ;;  %v506_v53 = vadd.f32 %v473_v32, %v3603_v58  ;;  %v539_v58 = vmul.f32 0.5, %v507_v55 }
  0xe1   : > { %2443 = vmatmul.mubr.f32.gmra.mxu1 %v3556_v39  ;;  %v1269_v39 = vld [vmem:[#allocation8 + $0x40] sm:$0xff] }
  0xe2   : > { %2541 = vmatmul.mubr.f32.gmra.mxu0 %v531_v25  ;;  %2566 = vmatpush3.msra.mxu1 %v1271_v21  ;;  %v538_v13 = vmul.f32 0.5, %v506_v53 }
  0xe3   : > { %2543 = vmatprep.mubr.f32.mxu0 %v532_v6  ;;  %2445 = vmatprep.mubr.f32.mxu1 %v3563_v41  ;;  %v1268_v41 = vld [vmem:[#allocation8 + $0x38] sm:$0xff] }
  0xe4   : > { %2567 = vmatprep.subr.mxu1 %v1270_v30 }
  0xe5   : > { %2446 = vmatmul.mubr.f32.gmra.mxu1 %v3578_v49  ;;  %v537_v49 = vmul.f32 0.5, %v505_v35 }
  0xe6   : > { %2544 = vmatmul.mubr.f32.gmra.mxu0 %v533_v31  ;;  %2568 = vmatpush3.msra.mxu1 %v1270_v30 }
  0xe7   : > { %2546 = vmatprep.mubr.f32.mxu0 %v534_v8  ;;  %2448 = vmatprep.mubr.f32.mxu1 %v3585_v52  ;;  %v1266_v52 = vld [vmem:[#allocation8 + $0x28] sm:$0xff] }
  0xe8   : > { %2569 = vmatprep.subr.mxu1 %v1269_v39 }
  0xe9   : > { %2449 = vmatmul.mubr.f32.gmra.mxu1 %v3600_v56  ;;  %v1265_v56 = vld [vmem:[#allocation8 + $0x20] sm:$0xff] }
  0xea   : > { %2547 = vmatmul.mubr.f32.gmra.mxu0 %v535_v11  ;;  %2570 = vmatpush3.msra.mxu1 %v1269_v39 }
  0xeb   : > { %2549 = vmatprep.mubr.f32.mxu0 %v536_v44  ;;  %2451 = vmatprep.mubr.f32.mxu1 %v3607_v12  ;;  %v1264_v12 = vld [vmem:[#allocation8 + $0x18] sm:$0xff] }
  0xec   : > { %2571 = vmatprep.subr.mxu1 %v1268_v41 }
  0xed   : > { %2452 = vmatmul.mubr.f32.gmra.mxu1 %v3622_v0  ;;  %v1554_v0 = vld [vmem:[#allocation10 + $0x68] sm:$0xff] }
  0xee   : > { %2550 = vmatmul.mubr.f32.gmra.mxu0 %v537_v49  ;;  %2572 = vmatpush3.msra.mxu1 %v1268_v41 }
  0xef   : > { %2552 = vmatprep.mubr.f32.mxu0 %v538_v13  ;;  %2454 = vmatprep.mubr.f32.mxu1 %v3626_v14  ;;  %v1553_v14 = vld [vmem:[#allocation10 + $0x60] sm:$0xff] }
  0xf0   : > { %2573 = vmatprep.subr.mxu1 %v1267_v40  ;;  %2639 = vmatprep.subr.mxu0 %v1554_v0 }
  0xf1   : > { %2455 = vmatmul.mubr.f32.gmra.mxu1 %v3636_v16  ;;  %2640 = vmatpush3.msra.mxu0 %v1554_v0  ;;  %v1547_v16 = vld [vmem:[#allocation10 + $0x30] sm:$0xff] }
  0xf2   : > { %2553 = vmatmul.mubr.f32.gmra.mxu0 %v539_v58  ;;  %2574 = vmatpush3.msra.mxu1 %v1267_v40 }
  0xf3   : > { %2457 = vmatprep.mubr.f32.mxu1 %v3640_v43  ;;  %2575 = vmatprep.subr.mxu1 %v1266_v52  ;;  %v1546_v43 = vld [vmem:[#allocation10 + $0x28] sm:$0xff] }
  0xf4   : > { %2576 = vmatpush3.msra.mxu1 %v1266_v52  ;;  %2641 = vmatprep.subr.mxu0 %v1553_v14 }
  0xf5   : > { %2458 = vmatmul.mubr.f32.gmra.mxu1 %v3648_v50  ;;  %2577 = vmatprep.subr.mxu1 %v1265_v56 }
  0xf6   : > { %2460 = vmatprep.mubr.f32.mxu1 %v3652_v20  ;;  %2578 = vmatpush3.msra.mxu1 %v1265_v56 }
  0xf7   : > { %2579 = vmatprep.subr.mxu1 %v1264_v12  ;;  %2642 = vmatpush3.msra.mxu0 %v1553_v14 }
  0xf8   : > { %2580 = vmatpush3.msra.mxu1 %v1264_v12  ;;  %2643 = vmatprep.subr.mxu0 %v1552_v15 }
  0xf9   : > { %2461 = vmatmul.mubr.f32.gmra.mxu1 %v3660_v60  ;;  %2581 = vmatprep.subr.mxu1 %v1263_v61 }
  0xfa   : > { %2463 = vmatprep.mubr.f32.mxu1 %v3664_v27  ;;  %2582 = vmatpush3.msra.mxu1 %v1263_v61 }
  0xfb   : > { %2583 = vmatprep.subr.mxu1 %v1262_v48  ;;  %2644 = vmatpush3.msra.mxu0 %v1552_v15 }
  0xfc   : > { %2584 = vmatpush3.msra.mxu1 %v1262_v48  ;;  %2645 = vmatprep.subr.mxu0 %v1551_v57 }
  0xfd   : > { %2464 = vmatmul.mubr.f32.gmra.mxu1 %v3672_v3  ;;  %2585 = vmatprep.subr.mxu1 %v1261_v51 }
  0xfe   : > { %2466 = vmatprep.mubr.f32.mxu1 %v3676_v33  ;;  %2586 = vmatpush3.msra.mxu1 %v1261_v51  ;;  %v3757_v33 = vld [vmem:[%s4215_s4] ss:$0 sm:$0xff] }
  0xff   : > { %2646 = vmatpush3.msra.mxu0 %v1551_v57 }
 0x100   : > { %2647 = vmatprep.subr.mxu0 %v1550_v24 }
 0x101   : > { %2467 = vmatmul.mubr.f32.gmra.mxu1 %v3684_v23  ;;  %2648 = vmatpush3.msra.mxu0 %v1550_v24 }
 0x102   : > { %2469 = vmatprep.mubr.f32.mxu1 %v3688_v9  ;;  %2649 = vmatprep.subr.mxu0 %v1549_v1 }
 0x103   : > { %2650 = vmatpush3.msra.mxu0 %v1549_v1 }
 0x104   : > { %2651 = vmatprep.subr.mxu0 %v1548_v17 }
 0x105   : > { %2470 = vmatmul.mubr.f32.gmra.mxu1 %v3696_v46  ;;  %2652 = vmatpush3.msra.mxu0 %v1548_v17 }
 0x106   : > { %2472 = vmatprep.mubr.f32.mxu1 %v473_v32  ;;  %2653 = vmatprep.subr.mxu0 %v1547_v16 }
 0x107   : > { %2654 = vmatpush3.msra.mxu0 %v1547_v16 }
 0x108   : > { %2655 = vmatprep.subr.mxu0 %v1546_v43 }
 0x109   : > { %2473 = vmatmul.mubr.f32.gmra.mxu1 %v475_v10  ;;  %2656 = vmatpush3.msra.mxu0 %v1546_v43 }
 0x10a   : > { %2657 = vmatprep.subr.mxu0 %v1545_v47 }
 0x10b   : > { %2658 = vmatpush3.msra.mxu0 %v1545_v47 }
 0x10c   : > { %2659 = vmatprep.subr.mxu0 %v1544_v28 }
 0x10d   : > { %2660 = vmatpush3.msra.mxu0 %v1544_v28 }
 0x10e   : > { %2661 = vmatprep.subr.mxu0 %v1543_v18 }
 0x10f   : > { %2662 = vmatpush3.msra.mxu0 %v1543_v18 }
 0x156   : > { %v3722_v37 = vpop.f32.mrf.mxu0 }
 0x158   : > { %v3724_v19 = vpop.f32.mrf.mxu0 }
 0x15a   : > { %v3726_v50 = vpop.f32.mrf.mxu0 }
 0x15c   : > { %v3728_v20 = vpop.f32.mrf.mxu0  ;;  %v3763_v31 = vpop.f32.mrf.mxu1 }
 0x15e   : > { %v3730_v54 = vpop.f32.mrf.mxu0  ;;  %v3767_v32 = vpop.f32.mrf.mxu1 }
 0x160   : > { %v3732_v42 = vpop.f32.mrf.mxu0 }
 0x162   : > { %v3734_v5 = vpop.f32.mrf.mxu0 }
 0x164   : > { %v3736_v59 = vpop.f32.mrf.mxu0 }
 0x166   : > { %v3738_v26 = vpop.f32.mrf.mxu0 }
 0x168   : > { %v3740_v60 = vpop.f32.mrf.mxu0  ;;  %v3771_v53 = vpop.f32.mrf.mxu1 }
 0x16a   : > { %v3742_v27 = vpop.f32.mrf.mxu0  ;;  %v3775_v13 = vpop.f32.mrf.mxu1 }
 0x16c   : > { %v3744_v2 = vpop.f32.mrf.mxu0 }
 0x16e   : > { %v3746_v4 = vpop.f32.mrf.mxu0 }
 0x170   : > { %v3748_v29 = vpop.f32.mrf.mxu0 }
 0x172   : > { %v3750_v22 = vpop.f32.mrf.mxu0 }
 0x174   : > { %v3752_v7 = vpop.f32.mrf.mxu0  ;;  %v3779_v12 = vpop.f32.mrf.mxu1 }
 0x176   : > { %v2509_v3 = vpop.f32.mrf.mxu0  ;;  %v3783_v63 = vpop.f32.mrf.mxu1 }
 0x177   : > { %v1108_v34 = vadd.f32 %v2509_v3, %v3757_v33 }
 0x178   : > { %v1102_v21 = vpop.f32.mrf.mxu0 }
 0x179   : > { %v1103_v25 = vadd.f32 %v3757_v33, %v1102_v21  ;;  %v3787_v24 = vpop.f32.mrf.mxu1 }
 0x17a   : > { %v2512_v6 = vpop.f32.mrf.mxu0 }
 0x17b   : > { %2587 = vmatprep.mubr.f32.mxu1 %v1103_v25  ;;  %v1118_v9 = vadd.f32 %v2512_v6, %v3757_v33  ;;  %v3791_v47 = vpop.f32.mrf.mxu1 }
 0x17c   : > { %v1112_v36 = vpop.f32.mrf.mxu0  ;;  %2588 = vmatmul.mubr.f32.vlgmr.msra.gmra.mxu1 %v1108_v34 }
 0x17d   : > { %v1113_v23 = vadd.f32 %v3757_v33, %v1112_v36  ;;  %v3795_v25 = vpop.f32.mrf.mxu1 }
 0x17e   : > { %v2515_v30 = vpop.f32.mrf.mxu0  ;;  %4243 = vst [vmem:[#allocation16_spill] sm:$0xff] %v3795_v25 }
 0x17f   : > { %2590 = vmatprep.mubr.f32.mxu1 %v1113_v23  ;;  %v1128_v45 = vadd.f32 %v2515_v30, %v3757_v33 }
 0x180   : > { %v1122_v38 = vpop.f32.mrf.mxu0  ;;  %2591 = vmatmul.mubr.f32.gmra.mxu1 %v1118_v9  ;;  %v3799_v9 = vpop.f32.mrf.mxu1 }
 0x181   : > { %v1123_v8 = vadd.f32 %v3757_v33, %v1122_v38  ;;  %4244 = vst [vmem:[#allocation17_spill] sm:$0xff] %v3799_v9 }
 0x182   : > { %v2518_v46 = vpop.f32.mrf.mxu0 }
 0x183   : > { %2593 = vmatprep.mubr.f32.mxu1 %v1123_v8  ;;  %v1138_v35 = vadd.f32 %v2518_v46, %v3757_v33  ;;  %v3803_v46 = vpop.f32.mrf.mxu1 }
 0x184   : > { %v1132_v39 = vpop.f32.mrf.mxu0  ;;  %2594 = vmatmul.mubr.f32.gmra.mxu1 %v1128_v45  ;;  %4245 = vst [vmem:[#allocation18_spill] sm:$0xff] %v3803_v46 }
 0x185   : > { %v1133_v11 = vadd.f32 %v3757_v33, %v1132_v39 }
 0x186   : > { %v2521_v44 = vpop.f32.mrf.mxu0 }
 0x187   : > { %2596 = vmatprep.mubr.f32.mxu1 %v1133_v11  ;;  %v1148_v49 = vadd.f32 %v2521_v44, %v3757_v33 }
 0x188   : > { %v1142_v10 = vpop.f32.mrf.mxu0  ;;  %2597 = vmatmul.mubr.f32.gmra.mxu1 %v1138_v35 }
 0x189   : > { %v1143_v41 = vadd.f32 %v3757_v33, %v1142_v10  ;;  %v3807_v10 = vpop.f32.mrf.mxu1 }
 0x18a   : > { %v2524_v55 = vpop.f32.mrf.mxu0  ;;  %4246 = vst [vmem:[#allocation19_spill] sm:$0xff] %v3807_v10 }
 0x18b   : > { %2599 = vmatprep.mubr.f32.mxu1 %v1143_v41  ;;  %v1158_v52 = vadd.f32 %v2524_v55, %v3757_v33 }
 0x18c   : > { %v1152_v40 = vpop.f32.mrf.mxu0  ;;  %2600 = vmatmul.mubr.f32.gmra.mxu1 %v1148_v49 }
 0x18d   : > { %v1153_v58 = vadd.f32 %v3757_v33, %v1152_v40 }
 0x18e   : > { %v2527_v56 = vpop.f32.mrf.mxu0 }
 0x18f   : > { %2602 = vmatprep.mubr.f32.mxu1 %v1153_v58  ;;  %v1168_v51 = vadd.f32 %v2527_v56, %v3757_v33  ;;  %v3811_v58 = vpop.f32.mrf.mxu1 }
 0x190   : > { %v1162_v61 = vpop.f32.mrf.mxu0  ;;  %2603 = vmatmul.mubr.f32.gmra.mxu1 %v1158_v52  ;;  %4247 = vst [vmem:[#allocation20_spill] sm:$0xff] %v3811_v58 }
 0x191   : > { %v1163_v48 = vadd.f32 %v3757_v33, %v1162_v61 }
 0x192   : > { %v2530_v62 = vpop.f32.mrf.mxu0 }
 0x193   : > { %2605 = vmatprep.mubr.f32.mxu1 %v1163_v48  ;;  %v1178_v15 = vadd.f32 %v2530_v62, %v3757_v33 }
 0x194   : > { %v1172_v0 = vpop.f32.mrf.mxu0  ;;  %2606 = vmatmul.mubr.f32.gmra.mxu1 %v1168_v51  ;;  %v3815_v51 = vpop.f32.mrf.mxu1 }
 0x195   : > { %v1173_v14 = vadd.f32 %v3757_v33, %v1172_v0  ;;  %4248 = vst [vmem:[#allocation21_spill] sm:$0xff] %v3815_v51 }
 0x196   : > { %v2533_v57 = vpop.f32.mrf.mxu0 }
 0x197   : > { %2608 = vmatprep.mubr.f32.mxu1 %v1173_v14  ;;  %v1188_v16 = vadd.f32 %v2533_v57, %v3757_v33 }
 0x198   : > { %v1182_v1 = vpop.f32.mrf.mxu0  ;;  %2609 = vmatmul.mubr.f32.gmra.mxu1 %v1178_v15  ;;  %v3819_v15 = vpop.f32.mrf.mxu1 }
 0x199   : > { %v1183_v17 = vadd.f32 %v3757_v33, %v1182_v1  ;;  %4249 = vst [vmem:[#allocation22_spill] sm:$0xff] %v3819_v15 }
 0x19a   : > { %v2536_v43 = vpop.f32.mrf.mxu0  ;;  %v3821_v57 = vpop.f32.mrf.mxu1 }
 0x19b   : > { %2611 = vmatprep.mubr.f32.mxu1 %v1183_v17  ;;  %v1198_v3 = vadd.f32 %v2536_v43, %v3757_v33  ;;  %4250 = vst [vmem:[#allocation23_spill] sm:$0xff] %v3821_v57  ;;  %v1542_v17 = vld [vmem:[#allocation10 + $0x8] sm:$0xff]  ;;  %v3890_v57 = vld [vmem:[%s4217_s6] ss:$0 sm:$0xff] }
 0x19c   : > { %v1192_v28 = vpop.f32.mrf.mxu0  ;;  %2612 = vmatmul.mubr.f32.gmra.mxu1 %v1188_v16  ;;  %v3823_v1 = vpop.f32.mrf.mxu1  ;;  %2663 = vmatprep.subr.mxu0 %v1542_v17  ;;  %v1541_v16 = vld [vmem:[#allocation10] sm:$0xff] }
 0x19d   : > { %v1193_v18 = vadd.f32 %v3757_v33, %v1192_v28  ;;  %2664 = vmatpush3.msra.mxu0 %v1542_v17 }
 0x19e   : > { %v2539_v21 = vpop.f32.mrf.mxu0  ;;  %v3825_v43 = vpop.f32.mrf.mxu1  ;;  %2665 = vmatprep.subr.mxu0 %v1541_v16 }
 0x19f   : > { %2614 = vmatprep.mubr.f32.mxu1 %v1193_v18  ;;  %v1208_v36 = vadd.f32 %v2539_v21, %v3757_v33  ;;  %2666 = vmatpush3.msra.mxu0 %v1541_v16 }
 0x1a0   : > { %v1202_v34 = vpop.f32.mrf.mxu0  ;;  %2615 = vmatmul.mubr.f32.gmra.mxu1 %v1198_v3  ;;  %v3827_v28 = vpop.f32.mrf.mxu1 }
 0x1a1   : > { %v1203_v6 = vadd.f32 %v3757_v33, %v1202_v34 }
 0x1a2   : > { %v2542_v23 = vpop.f32.mrf.mxu0  ;;  %v3829_v18 = vpop.f32.mrf.mxu1 }
 0x1a3   : > { %2617 = vmatprep.mubr.f32.mxu1 %v1203_v6  ;;  %v1218_v8 = vadd.f32 %v2542_v23, %v3757_v33 }
 0x1a4   : > { %v1212_v30 = vpop.f32.mrf.mxu0  ;;  %2618 = vmatmul.mubr.f32.gmra.mxu1 %v1208_v36 }
 0x1a5   : > { %v1213_v38 = vadd.f32 %v3757_v33, %v1212_v30 }
 0x1a6   : > { %v2545_v45 = vpop.f32.mrf.mxu0 }
 0x1a7   : > { %2620 = vmatprep.mubr.f32.mxu1 %v1213_v38  ;;  %v1228_v35 = vadd.f32 %v2545_v45, %v3757_v33 }
 0x1a8   : > { %v1222_v39 = vpop.f32.mrf.mxu0  ;;  %2621 = vmatmul.mubr.f32.gmra.mxu1 %v1218_v8 }
 0x1a9   : > { %v1223_v11 = vadd.f32 %v3757_v33, %v1222_v39 }
 0x1aa   : > { %v2548_v44 = vpop.f32.mrf.mxu0 }
 0x1ab   : > { %2623 = vmatprep.mubr.f32.mxu1 %v1223_v11  ;;  %v1238_v55 = vadd.f32 %v2548_v44, %v3757_v33 }
 0x1ac   : > { %v1232_v41 = vpop.f32.mrf.mxu0  ;;  %2624 = vmatmul.mubr.f32.gmra.mxu1 %v1228_v35 }
 0x1ad   : > { %v1233_v49 = vadd.f32 %v3757_v33, %v1232_v41 }
 0x1ae   : > { %v2551_v40 = vpop.f32.mrf.mxu0 }
 0x1af   : > { %2626 = vmatprep.mubr.f32.mxu1 %v1233_v49  ;;  %v1248_v61 = vadd.f32 %v2551_v40, %v3757_v33 }
 0x1b0   : > { %v1242_v52 = vpop.f32.mrf.mxu0  ;;  %2627 = vmatmul.mubr.f32.gmra.mxu1 %v1238_v55 }
 0x1b1   : > { %v1243_v56 = vadd.f32 %v3757_v33, %v1242_v52 }
 0x1b2   : > { %v2554_v48 = vpop.f32.mrf.mxu0 }
 0x1b3   : > { %2629 = vmatprep.mubr.f32.mxu1 %v1243_v56  ;;  %v1258_v14 = vadd.f32 %v2554_v48, %v3757_v33 }
 0x1b4   : > { %v1252_v62 = vpop.f32.mrf.mxu0  ;;  %2630 = vmatmul.mubr.f32.gmra.mxu1 %v1248_v61 }
 0x1b5   : > { %v1253_v0 = vadd.f32 %v3757_v33, %v1252_v62  ;;  %v3831_v33 = vpop.f32.mrf.mxu1 }
 0x1b7   : > { %2632 = vmatprep.mubr.f32.mxu1 %v1253_v0  ;;  %v3833_v3 = vpop.f32.mrf.mxu1 }
 0x1b8   : > { %2633 = vmatmul.mubr.f32.gmra.mxu1 %v1258_v14 }
 0x1b9   : > { %v3835_v21 = vpop.f32.mrf.mxu1 }
 0x1bb   : > { %v3837_v34 = vpop.f32.mrf.mxu1 }
 0x1bd   : > { %v3839_v6 = vpop.f32.mrf.mxu1 }
 0x1bf   : > { %v3841_v36 = vpop.f32.mrf.mxu1 }
 0x1c1   : > { %v3843_v23 = vpop.f32.mrf.mxu1 }
 0x1c3   : > { %v3845_v30 = vpop.f32.mrf.mxu1 }
 0x1c5   : > { %v3847_v38 = vpop.f32.mrf.mxu1 }
 0x1c7   : > { %v3849_v8 = vpop.f32.mrf.mxu1 }
 0x1c9   : > { %v3851_v45 = vpop.f32.mrf.mxu1 }
 0x1cb   : > { %v3853_v39 = vpop.f32.mrf.mxu1 }
 0x1cd   : > { %v3855_v11 = vpop.f32.mrf.mxu1 }
 0x1cf   : > { %v3857_v35 = vpop.f32.mrf.mxu1 }
 0x1d1   : > { %v3859_v44 = vpop.f32.mrf.mxu1 }
 0x1d3   : > { %v3861_v41 = vpop.f32.mrf.mxu1 }
 0x1d5   : > { %v3863_v49 = vpop.f32.mrf.mxu1 }
 0x1d7   : > { %v3865_v55 = vpop.f32.mrf.mxu1 }
 0x1d9   : > { %v3867_v40 = vpop.f32.mrf.mxu1 }
 0x1db   : > { %v3869_v52 = vpop.f32.mrf.mxu1 }
 0x1dc   : > { %4251 = vst [vmem:[#allocation24_spill] sm:$0xff] %v3869_v52 }
 0x1dd   : > { %v3871_v56 = vpop.f32.mrf.mxu1 }
 0x1de   : > { %4252 = vst [vmem:[#allocation25_spill] sm:$0xff] %v3871_v56 }
 0x1df   : > { %v3873_v61 = vpop.f32.mrf.mxu1 }
 0x1e0   : > { %4253 = vst [vmem:[#allocation26_spill] sm:$0xff] %v3873_v61 }
 0x1e1   : > { %v3875_v48 = vpop.f32.mrf.mxu1 }
 0x1e2   : > { %4254 = vst [vmem:[#allocation27_spill] sm:$0xff] %v3875_v48 }
 0x1e3   : > { %v3877_v62 = vpop.f32.mrf.mxu1 }
 0x1e4   : > { %4255 = vst [vmem:[#allocation28_spill] sm:$0xff] %v3877_v62 }
 0x1e5   : > { %v3879_v0 = vpop.f32.mrf.mxu1 }
 0x1e6   : > { %4256 = vst [vmem:[#allocation29_spill] sm:$0xff] %v3879_v0 }
 0x1e7   : > { %v3881_v14 = vpop.f32.mrf.mxu1 }
 0x1e8   : > { %4257 = vst [vmem:[#allocation30_spill] sm:$0xff] %v3881_v14 }
 0x1e9   : > { %v3883_v17 = vpop.f32.mrf.mxu1 }
 0x1ea   : > { %4258 = vst [vmem:[#allocation31_spill] sm:$0xff] %v3883_v17 }
 0x1eb   : > { %v3885_v16 = vpop.f32.mrf.mxu1 }
 0x1ec   : > { %4259 = vst [vmem:[#allocation32_spill] sm:$0xff] %v3885_v16 }
 0x23c   : > { %v2589_v15 = vpop.f32.mrf.mxu1 }
 0x23d   : > { %v1356_v51 = vadd.f32 %v2589_v15, %v3890_v57 }
 0x23e   : > { %v1350_v58 = vpop.f32.mrf.mxu1 }
 0x23f   : > { %v1351_v10 = vadd.f32 %v3890_v57, %v1350_v58  ;;  %v1510_v0 = vmax.f32 %v1356_v51, 0.0 }
 0x240   : > { %v2592_v62 = vpop.f32.mrf.mxu1 }
 0x241   : > { %v1509_v48 = vmax.f32 %v1351_v10, 0.0  ;;  %v1366_v14 = vadd.f32 %v2592_v62, %v3890_v57 }
 0x242   : > { %v1360_v46 = vpop.f32.mrf.mxu1 }
 0x243   : > { %v1361_v17 = vadd.f32 %v3890_v57, %v1360_v46  ;;  %2667 = vmatprep.mubr.f32.mxu0 %v1509_v48  ;;  %v1512_v9 = vmax.f32 %v1366_v14, 0.0 }
 0x244   : > { %v2595_v16 = vpop.f32.mrf.mxu1  ;;  %2668 = vmatmul.mubr.f32.vlgmr.msra.gmra.mxu0 %v1510_v0 }
 0x245   : > { %v1511_v61 = vmax.f32 %v1361_v17, 0.0  ;;  %v1376_v56 = vadd.f32 %v2595_v16, %v3890_v57 }
 0x246   : > { %v1370_v25 = vpop.f32.mrf.mxu1 }
 0x247   : > { %v1371_v15 = vadd.f32 %v3890_v57, %v1370_v25  ;;  %2670 = vmatprep.mubr.f32.mxu0 %v1511_v61  ;;  %v1514_v51 = vmax.f32 %v1376_v56, 0.0 }
 0x248   : > { %v2598_v58 = vpop.f32.mrf.mxu1  ;;  %2671 = vmatmul.mubr.f32.gmra.mxu0 %v1512_v9 }
 0x249   : > { %v1513_v10 = vmax.f32 %v1371_v15, 0.0  ;;  %v1386_v62 = vadd.f32 %v2598_v58, %v3890_v57 }
 0x24a   : > { %v1380_v52 = vpop.f32.mrf.mxu1 }
 0x24b   : > { %v1381_v46 = vadd.f32 %v3890_v57, %v1380_v52  ;;  %2673 = vmatprep.mubr.f32.mxu0 %v1513_v10  ;;  %v1516_v14 = vmax.f32 %v1386_v62, 0.0 }
 0x24c   : > { %v2601_v48 = vpop.f32.mrf.mxu1  ;;  %2674 = vmatmul.mubr.f32.gmra.mxu0 %v1514_v51 }
 0x24d   : > { %v1515_v0 = vmax.f32 %v1381_v46, 0.0  ;;  %v1396_v17 = vadd.f32 %v2601_v48, %v3890_v57 }
 0x24e   : > { %v1390_v16 = vpop.f32.mrf.mxu1 }
 0x24f   : > { %v1391_v25 = vadd.f32 %v3890_v57, %v1390_v16  ;;  %2676 = vmatprep.mubr.f32.mxu0 %v1515_v0  ;;  %v1518_v56 = vmax.f32 %v1396_v17, 0.0 }
 0x250   : > { %v2604_v61 = vpop.f32.mrf.mxu1  ;;  %2677 = vmatmul.mubr.f32.gmra.mxu0 %v1516_v14 }
 0x251   : > { %v1517_v9 = vmax.f32 %v1391_v25, 0.0  ;;  %v1406_v15 = vadd.f32 %v2604_v61, %v3890_v57 }
 0x252   : > { %v1400_v58 = vpop.f32.mrf.mxu1 }
 0x253   : > { %v1401_v52 = vadd.f32 %v3890_v57, %v1400_v58  ;;  %2679 = vmatprep.mubr.f32.mxu0 %v1517_v9  ;;  %v1520_v62 = vmax.f32 %v1406_v15, 0.0 }
 0x254   : > { %v2607_v10 = vpop.f32.mrf.mxu1  ;;  %2680 = vmatmul.mubr.f32.gmra.mxu0 %v1518_v56 }
 0x255   : > { %v1519_v51 = vmax.f32 %v1401_v52, 0.0  ;;  %v1416_v46 = vadd.f32 %v2607_v10, %v3890_v57 }
 0x256   : > { %v1410_v48 = vpop.f32.mrf.mxu1 }
 0x257   : > { %v1411_v16 = vadd.f32 %v3890_v57, %v1410_v48  ;;  %2682 = vmatprep.mubr.f32.mxu0 %v1519_v51  ;;  %v1522_v17 = vmax.f32 %v1416_v46, 0.0 }
 0x258   : > { %v2610_v0 = vpop.f32.mrf.mxu1  ;;  %2683 = vmatmul.mubr.f32.gmra.mxu0 %v1520_v62 }
 0x259   : > { %v1521_v14 = vmax.f32 %v1411_v16, 0.0  ;;  %v1426_v25 = vadd.f32 %v2610_v0, %v3890_v57 }
 0x25a   : > { %v1420_v61 = vpop.f32.mrf.mxu1 }
 0x25b   : > { %v1421_v58 = vadd.f32 %v3890_v57, %v1420_v61  ;;  %2685 = vmatprep.mubr.f32.mxu0 %v1521_v14  ;;  %v1524_v15 = vmax.f32 %v1426_v25, 0.0 }
 0x25c   : > { %v2613_v9 = vpop.f32.mrf.mxu1  ;;  %2686 = vmatmul.mubr.f32.gmra.mxu0 %v1522_v17 }
 0x25d   : > { %v1523_v56 = vmax.f32 %v1421_v58, 0.0  ;;  %v1436_v52 = vadd.f32 %v2613_v9, %v3890_v57 }
 0x25e   : > { %v1430_v10 = vpop.f32.mrf.mxu1 }
 0x25f   : > { %v1431_v48 = vadd.f32 %v3890_v57, %v1430_v10  ;;  %2688 = vmatprep.mubr.f32.mxu0 %v1523_v56  ;;  %v1526_v46 = vmax.f32 %v1436_v52, 0.0 }
 0x260   : > { %v2616_v51 = vpop.f32.mrf.mxu1  ;;  %2689 = vmatmul.mubr.f32.gmra.mxu0 %v1524_v15 }
 0x261   : > { %v1525_v62 = vmax.f32 %v1431_v48, 0.0  ;;  %v1446_v16 = vadd.f32 %v2616_v51, %v3890_v57 }
 0x262   : > { %v1440_v0 = vpop.f32.mrf.mxu1 }
 0x263   : > { %v1441_v61 = vadd.f32 %v3890_v57, %v1440_v0  ;;  %2691 = vmatprep.mubr.f32.mxu0 %v1525_v62  ;;  %v1528_v25 = vmax.f32 %v1446_v16, 0.0 }
 0x264   : > { %v2619_v14 = vpop.f32.mrf.mxu1  ;;  %2692 = vmatmul.mubr.f32.gmra.mxu0 %v1526_v46 }
 0x265   : > { %v1527_v17 = vmax.f32 %v1441_v61, 0.0  ;;  %v1456_v58 = vadd.f32 %v2619_v14, %v3890_v57 }
 0x266   : > { %v1450_v9 = vpop.f32.mrf.mxu1 }
 0x267   : > { %v1451_v10 = vadd.f32 %v3890_v57, %v1450_v9  ;;  %2694 = vmatprep.mubr.f32.mxu0 %v1527_v17  ;;  %v1530_v52 = vmax.f32 %v1456_v58, 0.0 }
 0x268   : > { %v2622_v56 = vpop.f32.mrf.mxu1  ;;  %2695 = vmatmul.mubr.f32.gmra.mxu0 %v1528_v25 }
 0x269   : > { %v1529_v15 = vmax.f32 %v1451_v10, 0.0  ;;  %v1466_v48 = vadd.f32 %v2622_v56, %v3890_v57 }
 0x26a   : > { %v1460_v51 = vpop.f32.mrf.mxu1 }
 0x26b   : > { %v1461_v0 = vadd.f32 %v3890_v57, %v1460_v51  ;;  %2697 = vmatprep.mubr.f32.mxu0 %v1529_v15  ;;  %v1532_v16 = vmax.f32 %v1466_v48, 0.0 }
 0x26c   : > { %v2625_v62 = vpop.f32.mrf.mxu1  ;;  %2698 = vmatmul.mubr.f32.gmra.mxu0 %v1530_v52 }
 0x26d   : > { %v1531_v46 = vmax.f32 %v1461_v0, 0.0  ;;  %v1476_v61 = vadd.f32 %v2625_v62, %v3890_v57 }
 0x26e   : > { %v1470_v14 = vpop.f32.mrf.mxu1 }
 0x26f   : > { %v1471_v9 = vadd.f32 %v3890_v57, %v1470_v14  ;;  %2700 = vmatprep.mubr.f32.mxu0 %v1531_v46  ;;  %v1534_v58 = vmax.f32 %v1476_v61, 0.0 }
 0x270   : > { %v2628_v17 = vpop.f32.mrf.mxu1  ;;  %2701 = vmatmul.mubr.f32.gmra.mxu0 %v1532_v16 }
 0x271   : > { %v1533_v25 = vmax.f32 %v1471_v9, 0.0  ;;  %v1486_v10 = vadd.f32 %v2628_v17, %v3890_v57 }
 0x272   : > { %v1480_v56 = vpop.f32.mrf.mxu1 }
 0x273   : > { %v1481_v51 = vadd.f32 %v3890_v57, %v1480_v56  ;;  %2703 = vmatprep.mubr.f32.mxu0 %v1533_v25  ;;  %v1536_v48 = vmax.f32 %v1486_v10, 0.0  ;;  %v3927_v10 = vld [vmem:[%s4213_s2] ss:$0 sm:$0xff] }
 0x274   : > { %v2631_v15 = vpop.f32.mrf.mxu1  ;;  %2704 = vmatmul.mubr.f32.gmra.mxu0 %v1534_v58 }
 0x275   : > { %v1535_v52 = vmax.f32 %v1481_v51, 0.0  ;;  %v1496_v0 = vadd.f32 %v2631_v15, %v3890_v57  ;;  %v3932_v51 = vld [vmem:[%s4219_s8] ss:$0 sm:$0xff] }
 0x276   : > { %v1490_v62 = vpop.f32.mrf.mxu1 }
 0x277   : > { %v1491_v14 = vadd.f32 %v3890_v57, %v1490_v62  ;;  %2706 = vmatprep.mubr.f32.mxu0 %v1535_v52  ;;  %v1538_v61 = vmax.f32 %v1496_v0, 0.0  ;;  %v860_v52 = vadd.f32 %v3823_v1, %v3927_v10  ;;  %v630_v0 = vadd.f32 %v3927_v10, %v3724_v19 }
 0x278   : > { %v2634_v46 = vpop.f32.mrf.mxu1  ;;  %2707 = vmatmul.mubr.f32.gmra.mxu0 %v1536_v48  ;;  %v870_v1 = vadd.f32 %v3827_v28, %v3927_v10  ;;  %v865_v28 = vadd.f32 %v3927_v10, %v3829_v18 }
 0x279   : > { %v1537_v16 = vmax.f32 %v1491_v14, 0.0  ;;  %v1506_v9 = vadd.f32 %v2634_v46, %v3890_v57  ;;  %v855_v14 = vadd.f32 %v3927_v10, %v3825_v43 }
 0x27a   : > { %v1500_v17 = vpop.f32.mrf.mxu1 }
 0x27b   : > { %v1501_v56 = vadd.f32 %v3890_v57, %v1500_v17  ;;  %2709 = vmatprep.mubr.f32.mxu0 %v1537_v16  ;;  %v1540_v58 = vmax.f32 %v1506_v9, 0.0  ;;  %v635_v57 = vadd.f32 %v3722_v37, %v3927_v10  ;;  %v645_v9 = vadd.f32 %v3726_v50, %v3927_v10 }
 0x27c   : > { %2710 = vmatmul.mubr.f32.gmra.mxu0 %v1538_v61  ;;  %v640_v50 = vadd.f32 %v3927_v10, %v3728_v20 }
 0x27d   : > { %v1539_v25 = vmax.f32 %v1501_v56, 0.0 }
 0x27f   : > { %2712 = vmatprep.mubr.f32.mxu0 %v1539_v25 }
 0x280   : > { %2713 = vmatmul.mubr.f32.gmra.mxu0 %v1540_v58 }
 0x304   : > { %v2669_v15 = vpop.f32.mrf.mxu0 }
 0x305   : > { %v1636_v48 = vadd.f32 %v2669_v15, %v3932_v51 }
 0x306   : > { %v1630_v62 = vpop.f32.mrf.mxu0 }
 0x307   : > { %v1790_v46 = vadd.f32 %v1636_v48, %v635_v57  ;;  %v1854_v16 = vadd.f32 %v1636_v48, %v860_v52  ;;  %v1631_v61 = vadd.f32 %v3932_v51, %v1630_v62  ;;  %v655_v57 = vadd.f32 %v3730_v54, %v3927_v10 }
 0x308   : > { %v2672_v37 = vpop.f32.mrf.mxu0  ;;  %v880_v48 = vadd.f32 %v3831_v33, %v3927_v10  ;;  %v650_v62 = vadd.f32 %v3927_v10, %v3732_v42 }
 0x309   : > { %1822 = vst [vmem:[%s3950_s26 + $0x10] sm:$0xff] %v1790_v46  ;;  %1886 = vst [vmem:[%s3950_s26 + $0x18] sm:$0xff] %v1854_v16  ;;  %v1789_v19 = vadd.f32 %v1631_v61, %v630_v0  ;;  %v1853_v43 = vadd.f32 %v1631_v61, %v855_v14  ;;  %v1646_v17 = vadd.f32 %v2672_v37, %v3932_v51 }
 0x30a   : > { %v1640_v56 = vpop.f32.mrf.mxu0  ;;  %v875_v46 = vadd.f32 %v3927_v10, %v3833_v3  ;;  %v665_v61 = vadd.f32 %v3734_v5, %v3927_v10  ;;  %v890_v37 = vadd.f32 %v3835_v21, %v3927_v10 }
 0x30b   : > { %1821 = vst [vmem:[%s3950_s26] sm:$0xff] %v1789_v19  ;;  %1885 = vst [vmem:[%s3950_s26 + $0x8] sm:$0xff] %v1853_v43  ;;  %v1792_v25 = vadd.f32 %v1646_v17, %v645_v9  ;;  %v1856_v58 = vadd.f32 %v1646_v17, %v870_v1  ;;  %v1641_v15 = vadd.f32 %v3932_v51, %v1640_v56 }
 0x30c   : > { %v2675_v52 = vpop.f32.mrf.mxu0  ;;  %v660_v19 = vadd.f32 %v3927_v10, %v3736_v59  ;;  %v885_v17 = vadd.f32 %v3927_v10, %v3837_v34  ;;  %v675_v56 = vadd.f32 %v3738_v26, %v3927_v10 }
 0x30d   : > { %1824 = vst [vmem:[%s3950_s26 + $0x30] sm:$0xff] %v1792_v25  ;;  %1888 = vst [vmem:[%s3950_s26 + $0x38] sm:$0xff] %v1856_v58  ;;  %v1791_v20 = vadd.f32 %v1641_v15, %v640_v50  ;;  %v1855_v18 = vadd.f32 %v1641_v15, %v865_v28  ;;  %v1656_v0 = vadd.f32 %v2675_v52, %v3932_v51 }
 0x30e   : > { %v1650_v14 = vpop.f32.mrf.mxu0  ;;  %v900_v25 = vadd.f32 %v3839_v6, %v3927_v10  ;;  %v670_v15 = vadd.f32 %v3927_v10, %v3740_v60  ;;  %v895_v52 = vadd.f32 %v3927_v10, %v3841_v36 }
 0x30f   : > { %1823 = vst [vmem:[%s3950_s26 + $0x20] sm:$0xff] %v1791_v20  ;;  %1887 = vst [vmem:[%s3950_s26 + $0x28] sm:$0xff] %v1855_v18  ;;  %v1794_v54 = vadd.f32 %v1656_v0, %v655_v57  ;;  %v1858_v33 = vadd.f32 %v1656_v0, %v880_v48  ;;  %v1651_v16 = vadd.f32 %v3932_v51, %v1650_v14 }
 0x310   : > { %v2678_v9 = vpop.f32.mrf.mxu0  ;;  %v685_v20 = vadd.f32 %v3742_v27, %v3927_v10  ;;  %v910_v0 = vadd.f32 %v3843_v23, %v3927_v10  ;;  %v680_v14 = vadd.f32 %v3927_v10, %v3744_v2 }
 0x311   : > { %1826 = vst [vmem:[%s3950_s26 + $0x50] sm:$0xff] %v1794_v54  ;;  %1890 = vst [vmem:[%s3950_s26 + $0x58] sm:$0xff] %v1858_v33  ;;  %v1793_v42 = vadd.f32 %v1651_v16, %v650_v62  ;;  %v1857_v3 = vadd.f32 %v1651_v16, %v875_v46  ;;  %v1666_v1 = vadd.f32 %v2678_v9, %v3932_v51 }
 0x312   : > { %v1660_v43 = vpop.f32.mrf.mxu0  ;;  %v905_v54 = vadd.f32 %v3927_v10, %v3845_v30  ;;  %v695_v16 = vadd.f32 %v3746_v4, %v3927_v10  ;;  %v920_v9 = vadd.f32 %v3847_v38, %v3927_v10 }
 0x313   : > { %1825 = vst [vmem:[%s3950_s26 + $0x40] sm:$0xff] %v1793_v42  ;;  %1889 = vst [vmem:[%s3950_s26 + $0x48] sm:$0xff] %v1857_v3  ;;  %v1796_v5 = vadd.f32 %v1666_v1, %v665_v61  ;;  %v1860_v21 = vadd.f32 %v1666_v1, %v890_v37  ;;  %v1661_v50 = vadd.f32 %v3932_v51, %v1660_v43 }
 0x314   : > { %v2681_v28 = vpop.f32.mrf.mxu0  ;;  %v690_v42 = vadd.f32 %v3927_v10, %v3748_v29  ;;  %v915_v1 = vadd.f32 %v3927_v10, %v3849_v8  ;;  %v705_v43 = vadd.f32 %v3750_v22, %v3927_v10 }
 0x315   : > { %1828 = vst [vmem:[%s3950_s26 + $0x70] sm:$0xff] %v1796_v5  ;;  %1892 = vst [vmem:[%s3950_s26 + $0x78] sm:$0xff] %v1860_v21  ;;  %v1795_v59 = vadd.f32 %v1661_v50, %v660_v19  ;;  %v1859_v34 = vadd.f32 %v1661_v50, %v885_v17  ;;  %v1676_v58 = vadd.f32 %v2681_v28, %v3932_v51 }
 0x316   : > { %v1670_v57 = vpop.f32.mrf.mxu0  ;;  %v930_v5 = vadd.f32 %v3851_v45, %v3927_v10  ;;  %v700_v50 = vadd.f32 %v3927_v10, %v3752_v7  ;;  %v925_v28 = vadd.f32 %v3927_v10, %v3853_v39 }
 0x317   : > { %1827 = vst [vmem:[%s3950_s26 + $0x60] sm:$0xff] %v1795_v59  ;;  %1891 = vst [vmem:[%s3950_s26 + $0x68] sm:$0xff] %v1859_v34  ;;  %v1798_v26 = vadd.f32 %v1676_v58, %v675_v56  ;;  %v1862_v6 = vadd.f32 %v1676_v58, %v900_v25  ;;  %v1671_v48 = vadd.f32 %v3932_v51, %v1670_v57 }
 0x318   : > { %v2684_v18 = vpop.f32.mrf.mxu0  ;;  %v715_v59 = vadd.f32 %v3763_v31, %v3927_v10  ;;  %v940_v58 = vadd.f32 %v3855_v11, %v3927_v10  ;;  %v710_v57 = vadd.f32 %v3927_v10, %v3767_v32 }
 0x319   : > { %1830 = vst [vmem:[%s3950_s26 + $0x90] sm:$0xff] %v1798_v26  ;;  %1894 = vst [vmem:[%s3950_s26 + $0x98] sm:$0xff] %v1862_v6  ;;  %v1797_v60 = vadd.f32 %v1671_v48, %v670_v15  ;;  %v1861_v36 = vadd.f32 %v1671_v48, %v895_v52  ;;  %v1686_v62 = vadd.f32 %v2684_v18, %v3932_v51 }
 0x31a   : > { %v1680_v46 = vpop.f32.mrf.mxu0  ;;  %v935_v26 = vadd.f32 %v3927_v10, %v3857_v35  ;;  %v725_v48 = vadd.f32 %v3771_v53, %v3927_v10  ;;  %v950_v18 = vadd.f32 %v3859_v44, %v3927_v10 }
 0x31b   : > { %1829 = vst [vmem:[%s3950_s26 + $0x80] sm:$0xff] %v1797_v60  ;;  %1893 = vst [vmem:[%s3950_s26 + $0x88] sm:$0xff] %v1861_v36  ;;  %v1800_v27 = vadd.f32 %v1686_v62, %v685_v20  ;;  %v1864_v23 = vadd.f32 %v1686_v62, %v910_v0  ;;  %v1681_v33 = vadd.f32 %v3932_v51, %v1680_v46 }
 0x31c   : > { %v2687_v61 = vpop.f32.mrf.mxu0  ;;  %v720_v60 = vadd.f32 %v3927_v10, %v3775_v13  ;;  %v945_v62 = vadd.f32 %v3927_v10, %v3861_v41  ;;  %v735_v46 = vadd.f32 %v3779_v12, %v3927_v10 }
 0x31d   : > { %1832 = vst [vmem:[%s3950_s26 + $0xb0] sm:$0xff] %v1800_v27  ;;  %1896 = vst [vmem:[%s3950_s26 + $0xb8] sm:$0xff] %v1864_v23  ;;  %v1799_v2 = vadd.f32 %v1681_v33, %v680_v14  ;;  %v1863_v30 = vadd.f32 %v1681_v33, %v905_v54  ;;  %v1696_v37 = vadd.f32 %v2687_v61, %v3932_v51 }
 0x31e   : > { %v1690_v3 = vpop.f32.mrf.mxu0  ;;  %v960_v27 = vadd.f32 %v3863_v49, %v3927_v10  ;;  %v730_v33 = vadd.f32 %v3927_v10, %v3783_v63  ;;  %v955_v61 = vadd.f32 %v3927_v10, %v3865_v55 }
 0x31f   : > { %1831 = vst [vmem:[%s3950_s26 + $0xa0] sm:$0xff] %v1799_v2  ;;  %1895 = vst [vmem:[%s3950_s26 + $0xa8] sm:$0xff] %v1863_v30  ;;  %v1802_v4 = vadd.f32 %v1696_v37, %v695_v16  ;;  %v1866_v38 = vadd.f32 %v1696_v37, %v920_v9  ;;  %v1691_v19 = vadd.f32 %v3932_v51, %v1690_v3 }
 0x320   : > { %v2690_v17 = vpop.f32.mrf.mxu0  ;;  %v745_v2 = vadd.f32 %v3787_v24, %v3927_v10  ;;  %v970_v37 = vadd.f32 %v3867_v40, %v3927_v10  ;;  %v740_v3 = vadd.f32 %v3927_v10, %v3791_v47 }
 0x321   : > { %1834 = vst [vmem:[%s3950_s26 + $0xd0] sm:$0xff] %v1802_v4  ;;  %1898 = vst [vmem:[%s3950_s26 + $0xd8] sm:$0xff] %v1866_v38  ;;  %v1801_v29 = vadd.f32 %v1691_v19, %v690_v42  ;;  %v1865_v8 = vadd.f32 %v1691_v19, %v915_v1  ;;  %v1706_v21 = vadd.f32 %v2690_v17, %v3932_v51  ;;  %v4260_v4 = vld [vmem:[#allocation24_spill] sm:$0xff] }
 0x322   : > { %v1700_v56 = vpop.f32.mrf.mxu0  ;;  %v965_v38 = vadd.f32 %v3927_v10, %v4260_v4 }
 0x323   : > { %1833 = vst [vmem:[%s3950_s26 + $0xc0] sm:$0xff] %v1801_v29  ;;  %1897 = vst [vmem:[%s3950_s26 + $0xc8] sm:$0xff] %v1865_v8  ;;  %v1804_v22 = vadd.f32 %v1706_v21, %v705_v43  ;;  %v1868_v45 = vadd.f32 %v1706_v21, %v930_v5  ;;  %v1701_v25 = vadd.f32 %v3932_v51, %v1700_v56  ;;  %v4261_v43 = vld [vmem:[#allocation16_spill] sm:$0xff]  ;;  %v4262_v29 = vld [vmem:[#allocation25_spill] sm:$0xff] }
 0x324   : > { %v2693_v34 = vpop.f32.mrf.mxu0  ;;  %v755_v17 = vadd.f32 %v4261_v43, %v3927_v10  ;;  %v980_v8 = vadd.f32 %v4262_v29, %v3927_v10  ;;  %v4263_v56 = vld [vmem:[#allocation17_spill] sm:$0xff] }
 0x325   : > { %1836 = vst [vmem:[%s3950_s26 + $0xf0] sm:$0xff] %v1804_v22  ;;  %1900 = vst [vmem:[%s3950_s26 + $0xf8] sm:$0xff] %v1868_v45  ;;  %v1803_v7 = vadd.f32 %v1701_v25, %v700_v50  ;;  %v1867_v39 = vadd.f32 %v1701_v25, %v925_v28  ;;  %v1716_v15 = vadd.f32 %v2693_v34, %v3932_v51  ;;  %v4264_v45 = vld [vmem:[#allocation26_spill] sm:$0xff] }
 0x326   : > { %v1710_v52 = vpop.f32.mrf.mxu0  ;;  %v750_v28 = vadd.f32 %v3927_v10, %v4263_v56  ;;  %v975_v25 = vadd.f32 %v3927_v10, %v4264_v45 }
 0x327   : > { %1835 = vst [vmem:[%s3950_s26 + $0xe0] sm:$0xff] %v1803_v7  ;;  %1899 = vst [vmem:[%s3950_s26 + $0xe8] sm:$0xff] %v1867_v39  ;;  %v1806_v31 = vadd.f32 %v1716_v15, %v715_v59  ;;  %v1870_v11 = vadd.f32 %v1716_v15, %v940_v58  ;;  %v1711_v6 = vadd.f32 %v3932_v51, %v1710_v52  ;;  %v4265_v7 = vld [vmem:[#allocation18_spill] sm:$0xff] }
 0x328   : > { %v2696_v20 = vpop.f32.mrf.mxu0  ;;  %v765_v39 = vadd.f32 %v4265_v7, %v3927_v10 }
 0x329   : > { %1838 = vst [vmem:[%s3950_s26 + $0x110] sm:$0xff] %v1806_v31  ;;  %1902 = vst [vmem:[%s3950_s26 + $0x118] sm:$0xff] %v1870_v11  ;;  %v1805_v32 = vadd.f32 %v1711_v6, %v710_v57  ;;  %v1869_v35 = vadd.f32 %v1711_v6, %v935_v26  ;;  %v1726_v0 = vadd.f32 %v2696_v20, %v3932_v51  ;;  %v4266_v57 = vld [vmem:[#allocation27_spill] sm:$0xff] }
 0x32a   : > { %v1720_v36 = vpop.f32.mrf.mxu0  ;;  %v990_v52 = vadd.f32 %v4266_v57, %v3927_v10  ;;  %v4267_v6 = vld [vmem:[#allocation19_spill] sm:$0xff] }
 0x32b   : > { %1837 = vst [vmem:[%s3950_s26 + $0x100] sm:$0xff] %v1805_v32  ;;  %1901 = vst [vmem:[%s3950_s26 + $0x108] sm:$0xff] %v1869_v35  ;;  %v1808_v53 = vadd.f32 %v1726_v0, %v725_v48  ;;  %v1872_v44 = vadd.f32 %v1726_v0, %v950_v18  ;;  %v1721_v14 = vadd.f32 %v3932_v51, %v1720_v36  ;;  %v4268_v18 = vld [vmem:[#allocation28_spill] sm:$0xff] }
 0x32c   : > { %v2699_v54 = vpop.f32.mrf.mxu0  ;;  %v760_v48 = vadd.f32 %v3927_v10, %v4267_v6  ;;  %v985_v32 = vadd.f32 %v3927_v10, %v4268_v18  ;;  %v4269_v36 = vld [vmem:[#allocation20_spill] sm:$0xff] }
 0x32d   : > { %1840 = vst [vmem:[%s3950_s26 + $0x130] sm:$0xff] %v1808_v53  ;;  %1904 = vst [vmem:[%s3950_s26 + $0x138] sm:$0xff] %v1872_v44  ;;  %v1807_v13 = vadd.f32 %v1721_v14, %v720_v60  ;;  %v1871_v41 = vadd.f32 %v1721_v14, %v945_v62  ;;  %v1736_v23 = vadd.f32 %v2699_v54, %v3932_v51  ;;  %v4270_v44 = vld [vmem:[#allocation29_spill] sm:$0xff] }
 0x32e   : > { %v1730_v16 = vpop.f32.mrf.mxu0  ;;  %v775_v62 = vadd.f32 %v4269_v36, %v3927_v10  ;;  %v1000_v14 = vadd.f32 %v4270_v44, %v3927_v10 }
 0x32f   : > { %1839 = vst [vmem:[%s3950_s26 + $0x120] sm:$0xff] %v1807_v13  ;;  %1903 = vst [vmem:[%s3950_s26 + $0x128] sm:$0xff] %v1871_v41  ;;  %v1810_v12 = vadd.f32 %v1736_v23, %v735_v46  ;;  %v1874_v49 = vadd.f32 %v1736_v23, %v960_v27  ;;  %v1731_v9 = vadd.f32 %v3932_v51, %v1730_v16  ;;  %v4271_v13 = vld [vmem:[#allocation21_spill] sm:$0xff] }
 0x330   : > { %v2702_v30 = vpop.f32.mrf.mxu0  ;;  %v770_v41 = vadd.f32 %v3927_v10, %v4271_v13 }
 0x331   : > { %1842 = vst [vmem:[%s3950_s26 + $0x150] sm:$0xff] %v1810_v12  ;;  %1906 = vst [vmem:[%s3950_s26 + $0x158] sm:$0xff] %v1874_v49  ;;  %v1809_v63 = vadd.f32 %v1731_v9, %v730_v33  ;;  %v1873_v55 = vadd.f32 %v1731_v9, %v955_v61  ;;  %v1746_v42 = vadd.f32 %v2702_v30, %v3932_v51  ;;  %v4272_v33 = vld [vmem:[#allocation30_spill] sm:$0xff] }
 0x332   : > { %v1740_v1 = vpop.f32.mrf.mxu0  ;;  %v995_v16 = vadd.f32 %v3927_v10, %v4272_v33  ;;  %v4273_v9 = vld [vmem:[#allocation22_spill] sm:$0xff] }
 0x333   : > { %1841 = vst [vmem:[%s3950_s26 + $0x140] sm:$0xff] %v1809_v63  ;;  %1905 = vst [vmem:[%s3950_s26 + $0x148] sm:$0xff] %v1873_v55  ;;  %v1812_v24 = vadd.f32 %v1746_v42, %v745_v2  ;;  %v1876_v40 = vadd.f32 %v1746_v42, %v970_v37  ;;  %v1741_v19 = vadd.f32 %v3932_v51, %v1740_v1  ;;  %v4274_v37 = vld [vmem:[#allocation31_spill] sm:$0xff] }
 0x334   : > { %v2705_v5 = vpop.f32.mrf.mxu0  ;;  %v785_v2 = vadd.f32 %v4273_v9, %v3927_v10  ;;  %v1010_v63 = vadd.f32 %v4274_v37, %v3927_v10  ;;  %v4275_v1 = vld [vmem:[#allocation23_spill] sm:$0xff] }
 0x335   : > { %1844 = vst [vmem:[%s3950_s26 + $0x170] sm:$0xff] %v1812_v24  ;;  %1908 = vst [vmem:[%s3950_s26 + $0x178] sm:$0xff] %v1876_v40  ;;  %v1811_v47 = vadd.f32 %v1741_v19, %v740_v3  ;;  %v1875_v21 = vadd.f32 %v1741_v19, %v965_v38  ;;  %v1756_v50 = vadd.f32 %v2705_v5, %v3932_v51  ;;  %v4276_v24 = vld [vmem:[#allocation32_spill] sm:$0xff] }
 0x336   : > { %v1750_v22 = vpop.f32.mrf.mxu0  ;;  %v780_v4 = vadd.f32 %v3927_v10, %v4275_v1  ;;  %v1005_v40 = vadd.f32 %v3927_v10, %v4276_v24 }
 0x337   : > { %1843 = vst [vmem:[%s3950_s26 + $0x160] sm:$0xff] %v1811_v47  ;;  %1907 = vst [vmem:[%s3950_s26 + $0x168] sm:$0xff] %v1875_v21  ;;  %v1814_v59 = vadd.f32 %v1756_v50, %v755_v17  ;;  %v1878_v34 = vadd.f32 %v1756_v50, %v980_v8  ;;  %v1751_v58 = vadd.f32 %v3932_v51, %v1750_v22 }
 0x338   : > { %v2708_v15 = vpop.f32.mrf.mxu0 }
 0x339   : > { %1846 = vst [vmem:[%s3950_s26 + $0x190] sm:$0xff] %v1814_v59  ;;  %1910 = vst [vmem:[%s3950_s26 + $0x198] sm:$0xff] %v1878_v34  ;;  %v1813_v26 = vadd.f32 %v1751_v58, %v750_v28  ;;  %v1877_v31 = vadd.f32 %v1751_v58, %v975_v25  ;;  %v1766_v11 = vadd.f32 %v2708_v15, %v3932_v51 }
 0x33a   : > { %v1760_v20 = vpop.f32.mrf.mxu0 }
 0x33b   : > { %1845 = vst [vmem:[%s3950_s26 + $0x180] sm:$0xff] %v1813_v26  ;;  %1909 = vst [vmem:[%s3950_s26 + $0x188] sm:$0xff] %v1877_v31  ;;  %v1816_v35 = vadd.f32 %v1766_v11, %v765_v39  ;;  %v1880_v0 = vadd.f32 %v1766_v11, %v990_v52  ;;  %v1761_v60 = vadd.f32 %v3932_v51, %v1760_v20 }
 0x33c   : > { %v2711_v53 = vpop.f32.mrf.mxu0 }
 0x33d   : > { %1848 = vst [vmem:[%s3950_s26 + $0x1b0] sm:$0xff] %v1816_v35  ;;  %1912 = vst [vmem:[%s3950_s26 + $0x1b8] sm:$0xff] %v1880_v0  ;;  %v1815_v46 = vadd.f32 %v1761_v60, %v760_v48  ;;  %v1879_v54 = vadd.f32 %v1761_v60, %v985_v32  ;;  %v1776_v27 = vadd.f32 %v2711_v53, %v3932_v51 }
 0x33e   : > { %v1770_v23 = vpop.f32.mrf.mxu0 }
 0x33f   : > { %1847 = vst [vmem:[%s3950_s26 + $0x1a0] sm:$0xff] %v1815_v46  ;;  %1911 = vst [vmem:[%s3950_s26 + $0x1a8] sm:$0xff] %v1879_v54  ;;  %v1818_v61 = vadd.f32 %v1776_v27, %v775_v62  ;;  %v1882_v12 = vadd.f32 %v1776_v27, %v1000_v14  ;;  %v1771_v49 = vadd.f32 %v3932_v51, %v1770_v23 }
 0x340   : > { %v2714_v30 = vpop.f32.mrf.mxu0 }
 0x341   : > { %1850 = vst [vmem:[%s3950_s26 + $0x1d0] sm:$0xff] %v1818_v61  ;;  %1914 = vst [vmem:[%s3950_s26 + $0x1d8] sm:$0xff] %v1882_v12  ;;  %v1817_v55 = vadd.f32 %v1771_v49, %v770_v41  ;;  %v1881_v42 = vadd.f32 %v1771_v49, %v995_v16  ;;  %v1786_v3 = vadd.f32 %v2714_v30, %v3932_v51 }
 0x342   : > { %v1780_v38 = vpop.f32.mrf.mxu0 }
 0x343   : > { %1849 = vst [vmem:[%s3950_s26 + $0x1c0] sm:$0xff] %v1817_v55  ;;  %1913 = vst [vmem:[%s3950_s26 + $0x1c8] sm:$0xff] %v1881_v42  ;;  %v1820_v19 = vadd.f32 %v1786_v3, %v785_v2  ;;  %v1884_v43 = vadd.f32 %v1786_v3, %v1010_v63  ;;  %v1781_v17 = vadd.f32 %v3932_v51, %v1780_v38 }
 0x345   : > { %1852 = vst [vmem:[%s3950_s26 + $0x1f0] sm:$0xff] %v1820_v19  ;;  %1916 = vst [vmem:[%s3950_s26 + $0x1f8] sm:$0xff] %v1884_v43  ;;  %v1819_v10 = vadd.f32 %v1781_v17, %v780_v4  ;;  %v1883_v5 = vadd.f32 %v1781_v17, %v1005_v40 }
 0x347   : > { %1851 = vst [vmem:[%s3950_s26 + $0x1e0] sm:$0xff] %v1819_v10  ;;  %1915 = vst [vmem:[%s3950_s26 + $0x1e8] sm:$0xff] %v1883_v5 }
 0x348   : > { %2985 = shalt.err (!%p2982_p3)
}
 0x349   : > { %s2986_s21 = scalar_lea.hbm %s4163_s22, 8192  ;;  %s2990_s25 = scalar_lea.hbm %s4220_s9, 32768 }
 0x34a   : > { %p2987_p0 = scmp.ne.s32.totalorder %s4163_s22, %s2986_s21  ;;  %p2991_p8 = scmp.lt.s32.totalorder %s4163_s22, %s4220_s9 }
 0x34b   : > { %p2992_p9 = scmp.lt.s32.totalorder %s2990_s25, %s2986_s21 }
 0x34c   : > { %p2988_p4 = pnand %p2987_p0, %p4277_p11 }
 0x34d   : > { %p2993_p2 = por %p2992_p9, %p2991_p8 }
 0x34e   : > { %p2989_p6 = pneg %p2988_p4 }
 0x350   : > { %p2994_p5 = pnand %p2993_p2, %p2989_p6 }
 0x352   : > { %2997 = shalt.err (!%p2994_p5)
}
 0x353   : > { %s3056_s5 = smov 256   ;;  %s3057_s13 = smov 16  }
 0x354   : > { %2765 = dma.vmem_to_hbm [thread:$0]  (%p4277_p11), %s4165_s27, 8192, %s4163_s22, %s1918_s28, %s3056_s5, %s3056_s5, %s3057_s13  }
 0x355 PF: > { %p2797_p7 = scmp.ge.s32.totalorder %s3044_s12, 2  ;;  %s1947_s15 = sand.u32 1, %s3032_s30  }
 0x356   : > { %p4278_p1 = scmp.ne.s32.totalorder %s4229_s16, 0  ;;  %s1948_s17 = scalar_lea.sflag [#allocation4], %s1947_s15 }
 0x358   : > { %p2785_p12 = pnand %p2797_p7, %p4278_p1 }
 0x35a   : > { %p2786_p13 = pneg %p2785_p12 }
 0x35c   : > { %3027 = dma.done.wait (%p2786_p13), %s1948_s17, 8192  }
 0x35d   : > { %3029 = vsyncadd (%p2786_p13), %s1948_s17, 4294959104  ;;  %p24_p10 = scmp.ge.s32.totalorder %s3207_s18, 6   ;;  %s4279_s30 = smov %s3036_s10 }
 0x35e   : > { %s4280_s10 = smov %s3040_s11  ;;  %s4281_s11 = smov %s3223_s23 }
 0x35f   : > { %s4282_s12 = smov %s3207_s18  ;;  %26 = sbr.rel (!%p24_p10) target bundleno = 11 (0xb), region = 117 }
 0x364   :  { %1953 = vsyncpa [#allocation3], 1 }
 0x365   :  { %1955 = vsyncpa [#allocation3 + $0x1], 1 }
 0x366   :  { %1956 = vsyncpa [#allocation6], 1 }
 0x367   :  { %1957 = vsyncpa [#allocation9], 1 }
 0x368   :  { %1958 = vsyncpa [#allocation4], 1 }
 0x369   :  { %1960 = vsyncpa [#allocation4 + $0x1], 1 }

</bundles_post_ra>
